<compile_context>
chip_gen: v7x
topology: tpu7x:2x2x1
jax: 0.10.0
libtpu: 0.0.40
codegen_flags: <defaults>
</compile_context>

<pallas_src>
import functools

import jax
import jax.numpy as jnp
from jax.experimental import pallas as pl
from jax.experimental.pallas import tpu as pltpu

LANE = 128


def _round_up(n, m):
    return ((n + m - 1) // m) * m


def _vmem_capacity_bytes(default=64 << 20):
    """Generation-aware VMEM capacity (64 MiB on v7x, 128 MiB on v5e/v6e)."""
    try:
        return int(getattr(pltpu.get_tpu_info(), "vmem_capacity_bytes", default))
    except Exception:
        return default


def _generator_kernel(nc,
                      x_ref,
                      w1_ref, b1_ref,
                      w2_ref, b2_ref,
                      w3_ref, b3_ref,
                      w4_ref, b4_ref,
                      o_ref):
    cdt = w1_ref.dtype  # MXU input dtype (bf16); accumulate in f32.

    x = x_ref[...].astype(cdt)  # (bt, nz) bf16, K left unpadded

    # Linear(nz, nf) + ReLU
    h = jnp.dot(x, w1_ref[...], preferred_element_type=jnp.float32) + b1_ref[...]
    h = jnp.maximum(h, 0.0)

    # Linear(nf, 2nf) + ReLU
    h = jnp.dot(h.astype(cdt), w2_ref[...], preferred_element_type=jnp.float32) + b2_ref[...]
    h = jnp.maximum(h, 0.0)

    # Linear(2nf, 4nf) + Tanh
    h = jnp.dot(h.astype(cdt), w3_ref[...], preferred_element_type=jnp.float32) + b3_ref[...]
    h = jnp.tanh(h)

    # Linear(4nf, nc): lane-aligned matmul (w4 cols padded to 128), but only
    # the real nc output columns are written back (unpadded HBM writeback).
    out = jnp.dot(h.astype(cdt), w4_ref[...], preferred_element_type=jnp.float32) + b4_ref[...]
    o_ref[...] = out[:, :nc].astype(o_ref.dtype)


def prepare_generator_params(params, compute_dtype=jnp.bfloat16):
    """One-time weight preparation (call at init, NOT per forward).

    Pads hidden/output feature dims to 128 lanes and casts weights to the MXU
    input dtype.  Layer-1's input dim stays unpadded so x can stream from HBM
    without lane padding.  Returns (prepared_arrays_tuple, nc).
    """
    (w1, b1), (w2, b2), (w3, b3), (w4, b4) = params
    d1, d2, d3, nc = w1.shape[1], w2.shape[1], w3.shape[1], w4.shape[1]
    d1_p, d2_p, d3_p, nc_p = (_round_up(d, LANE) for d in (d1, d2, d3, nc))
    w_dt = jnp.dtype(compute_dtype)

    def pad_w(w, rows, cols):
        return jnp.pad(w.astype(w_dt),
                       ((0, rows - w.shape[0]), (0, cols - w.shape[1])))

    def pad_b(b, cols):
        return jnp.pad(b.astype(jnp.float32), (0, cols - b.shape[0])).reshape(1, cols)

    prepared = (
        pad_w(w1, w1.shape[0], d1_p), pad_b(b1, d1_p),   # (nz,   d1_p)
        pad_w(w2, d1_p, d2_p), pad_b(b2, d2_p),          # (d1_p, d2_p)
        pad_w(w3, d2_p, d3_p), pad_b(b3, d3_p),          # (d2_p, d3_p)
        pad_w(w4, d3_p, nc_p), pad_b(b4, nc_p),          # (d3_p, nc_p)
    )
    return prepared, nc


def generator_forward(x, prepared, nc, *, batch_tile=256, weight_buffer_count=1):
    """Fused Generator forward.

    x: (B, nz, 1, 1) or (B, nz).  prepared: output of prepare_generator_params.
    Returns (B, nc) float32.

    batch_tile: rows per grid step.  It is clamped so the "parallel" grid has
      >= 4 steps when the batch allows it (2 per TensorCore on v7x); on v6e's
      128 MiB VMEM you can raise it (512/1024) for large batches.
    weight_buffer_count: 1 = single-buffer the grid-invariant weights/biases
      (saves VMEM); None = Pallas default double buffering.
    """
    w1p, b1p, w2p, b2p, w3p, b3p, w4p, b4p = prepared
    nz = w1p.shape[0]
    d1_p, d2_p, d3_p, nc_p = w1p.shape[1], w2p.shape[1], w3p.shape[1], w4p.shape[1]
    cdt = w1p.dtype

    # torch.reshape(x, (x.size(0), x.size(1))); stream x in the MXU input dtype.
    x2d = jnp.reshape(x, (x.shape[0], x.shape[1])).astype(cdt)
    B = x2d.shape[0]
    assert x2d.shape[1] == nz, "latent dim mismatch with prepared params"

    # Batch tile: multiple of 16 (bf16 sublane packing); prefer >= 4 grid steps
    # so x/out DMA overlaps compute even with 2 TensorCores sharing the grid.
    bt = max(16, _round_up(min(batch_tile, _round_up(B, 16)), 16))
    while bt > 16 and pl.cdiv(B, bt) < 4:
        bt = max(16, _round_up(bt // 2, 16))
    Bp = _round_up(B, bt)
    grid = (Bp // bt,)

    x_p = x2d if Bp == B else jnp.pad(x2d, ((0, Bp - B), (0, 0)))

    pmode = None if weight_buffer_count is None else pl.Buffered(weight_buffer_count)

    def const_spec(shape):
        # Grid-invariant operand: constant index_map; single buffer saves VMEM.
        return pl.BlockSpec(shape, lambda i: (0, 0), pipeline_mode=pmode)

    # VMEM budget: resident weights x buffer count, double-buffered x/out
    # tiles, activation headroom, plus 8 MiB slack; capped below the chip's
    # physical VMEM (64 MiB v7x / 128 MiB v5e,v6e) minus compiler headroom.
    w_itemsize = jnp.dtype(cdt).itemsize
    wbytes = (nz * d1_p + d1_p * d2_p + d2_p * d3_p + d3_p * nc_p) * w_itemsize
    bbytes = (d1_p + d2_p + d3_p + nc_p) * 4
    act_bytes = 4 * bt * max(d1_p, d2_p, d3_p, nc_p) * 4
    io_bytes = 2 * bt * nz * w_itemsize + 2 * bt * nc * 4
    n_wbuf = 2 if weight_buffer_count is None else weight_buffer_count
    vmem_est = wbytes * n_wbuf + 2 * bbytes + io_bytes + act_bytes
    vmem_cap = _vmem_capacity_bytes()
    vmem_limit = int(min(max(vmem_est + (8 << 20), 32 << 20), vmem_cap - (8 << 20)))

    flops = 2 * Bp * (nz * d1_p + d1_p * d2_p + d2_p * d3_p + d3_p * nc_p)
    bytes_accessed = x_p.size * w_itemsize + wbytes + bbytes + Bp * nc * 4
    cost = pl.CostEstimate(flops=flops, transcendentals=Bp * d3_p,
                           bytes_accessed=bytes_accessed)

    kernel = functools.partial(_generator_kernel, nc)

    out_p = pl.pallas_call(
        kernel,
        out_shape=jax.ShapeDtypeStruct((Bp, nc), jnp.float32),
        grid_spec=pltpu.PrefetchScalarGridSpec(
            num_scalar_prefetch=0,
            grid=grid,
            in_specs=[
                # x batch tile: full-extent (unpadded) last dim, bf16 stream.
                pl.BlockSpec((bt, nz), lambda i: (i, 0)),
                const_spec((nz, d1_p)), const_spec((1, d1_p)),
                const_spec((d1_p, d2_p)), const_spec((1, d2_p)),
                const_spec((d2_p, d3_p)), const_spec((1, d3_p)),
                const_spec((d3_p, nc_p)), const_spec((1, nc_p)),
            ],
            # Unpadded output writeback (full-extent last dim = nc).
            out_specs=pl.BlockSpec((bt, nc), lambda i: (i, 0)),
        ),
        compiler_params=pltpu.CompilerParams(
            dimension_semantics=("parallel",),
            vmem_limit_bytes=vmem_limit),
        cost_estimate=cost,
    )(x_p, w1p, b1p, w2p, b2p, w3p, b3p, w4p, b4p)

    return out_p if Bp == B else out_p[:B]


def init_generator_params(key, nz, nf, nc):
    """Deterministic init matching the layer shapes of the PyTorch module."""
    keys = jax.random.split(key, 8)
    dims = [(nz, nf), (nf, 2 * nf), (2 * nf, 4 * nf), (4 * nf, nc)]
    params = []
    for li, (din, dout) in enumerate(dims):
        bound = 1.0 / jnp.sqrt(jnp.float32(din))
        w = jax.random.uniform(keys[2 * li], (din, dout), jnp.float32,
                               minval=-bound, maxval=bound)
        b = jax.random.uniform(keys[2 * li + 1], (dout,), jnp.float32,
                               minval=-bound, maxval=bound)
        params.append((w, b))
    return params


def _reference_forward(x, params, compute_dtype=jnp.float32):
    """Pure-JAX reference. compute_dtype mimics the kernel's MXU input dtype
    (matmul inputs rounded to compute_dtype, accumulation in f32)."""
    x2d = jnp.reshape(x, (x.shape[0], x.shape[1])).astype(jnp.float32)
    (w1, b1), (w2, b2), (w3, b3), (w4, b4) = params

    def lin(h, w, b):
        hq = h.astype(compute_dtype).astype(jnp.float32)
        wq = w.astype(compute_dtype).astype(jnp.float32)
        return jnp.dot(hq, wq, preferred_element_type=jnp.float32) + b

    h = jnp.maximum(lin(x2d, w1, b1), 0.0)
    h = jnp.maximum(lin(h, w2, b2), 0.0)
    h = jnp.tanh(lin(h, w3, b3))
    return lin(h, w4, b4)


if __name__ == "__main__":
    key = jax.random.PRNGKey(0)
    k_param, k_x = jax.random.split(key)

    # Small shapes consistent with the module: nz latent, nf base width, nc out.
    # B=500 exercises batch padding (-> 512) and a 4-step "parallel" grid.
    B, nz, nf, nc = 500, 16, 32, 4

    params = init_generator_params(k_param, nz, nf, nc)
    # GAN-style latent noise, NCHW-like (B, nz, 1, 1)
    x = jax.random.normal(k_x, (B, nz, 1, 1), jnp.float32)

    # One-time weight prep: padding + bf16 cast hoisted out of the forward.
    prepared, nc_out = prepare_generator_params(params)
    prepared = jax.block_until_ready(prepared)

    fwd = jax.jit(lambda xx: generator_forward(xx, prepared, nc_out))
    try:
        out = fwd(x)
    except Exception:
        # Fallback for jax versions where single-buffered constant blocks
        # (pl.Buffered(1)) are not supported: default double buffering with a
        # smaller batch tile so the doubled weight buffers still fit VMEM.
        out = generator_forward(x, prepared, nc_out,
                                weight_buffer_count=None, batch_tile=128)
    out = jax.block_until_ready(out)

    assert out.shape == (B, nc)

    # Strict check against a reference that mimics the kernel's numerics
    # (bf16 matmul inputs, f32 accumulation).
    ref_bf16 = _reference_forward(x, params, compute_dtype=jnp.bfloat16)
    assert jnp.allclose(out, ref_bf16, atol=2e-3, rtol=2e-3), "mismatch vs bf16 reference"

    # Loose sanity check against the exact f32 reference (bf16 rounding noise only).
    ref_f32 = _reference_forward(x, params, compute_dtype=jnp.float32)
    assert jnp.allclose(out, ref_f32, atol=1e-1, rtol=1e-1), "mismatch vs f32 reference"

    print("KERNEL_OK")
</pallas_src>

<mosaic_0001>
module attributes {stable_mosaic.version = 11 : i64} {
  func.func @_generator_kernel(%arg0: i32, %arg1: memref<128x16xbf16, #tpu.memory_space<vmem>>, %arg2: memref<16x128xbf16, #tpu.memory_space<vmem>>, %arg3: memref<1x128xf32, #tpu.memory_space<vmem>>, %arg4: memref<128x128xbf16, #tpu.memory_space<vmem>>, %arg5: memref<1x128xf32, #tpu.memory_space<vmem>>, %arg6: memref<128x128xbf16, #tpu.memory_space<vmem>>, %arg7: memref<1x128xf32, #tpu.memory_space<vmem>>, %arg8: memref<128x128xbf16, #tpu.memory_space<vmem>>, %arg9: memref<1x128xf32, #tpu.memory_space<vmem>>, %arg10: memref<128x4xf32, #tpu.memory_space<vmem>>) attributes {dimension_semantics = [#tpu.dimension_semantics<parallel>], iteration_bounds = array<i64: 4>, scalar_prefetch = 0 : i64, scratch_operands = 0 : i64, tpu.core_type = #tpu.core_type<tc>, window_params = [{transform_indices = @transform_0, window_bounds = array<i64: 128, 16>}, {pipeline_mode = #tpu.pipeline_mode<synchronous>, transform_indices = @transform_1, window_bounds = array<i64: 16, 128>}, {pipeline_mode = #tpu.pipeline_mode<synchronous>, transform_indices = @transform_2, window_bounds = array<i64: 1, 128>}, {pipeline_mode = #tpu.pipeline_mode<synchronous>, transform_indices = @transform_3, window_bounds = array<i64: 128, 128>}, {pipeline_mode = #tpu.pipeline_mode<synchronous>, transform_indices = @transform_4, window_bounds = array<i64: 1, 128>}, {pipeline_mode = #tpu.pipeline_mode<synchronous>, transform_indices = @transform_5, window_bounds = array<i64: 128, 128>}, {pipeline_mode = #tpu.pipeline_mode<synchronous>, transform_indices = @transform_6, window_bounds = array<i64: 1, 128>}, {pipeline_mode = #tpu.pipeline_mode<synchronous>, transform_indices = @transform_7, window_bounds = array<i64: 128, 128>}, {pipeline_mode = #tpu.pipeline_mode<synchronous>, transform_indices = @transform_8, window_bounds = array<i64: 1, 128>}, {transform_indices = @transform_9, window_bounds = array<i64: 128, 4>}]} {
    %c0 = arith.constant 0 : index
    %c0_0 = arith.constant 0 : index
    %0 = vector.load %arg1[%c0, %c0_0] : memref<128x16xbf16, #tpu.memory_space<vmem>>, vector<128x16xbf16>
    %c0_1 = arith.constant 0 : index
    %c0_2 = arith.constant 0 : index
    %1 = vector.load %arg2[%c0_1, %c0_2] : memref<16x128xbf16, #tpu.memory_space<vmem>>, vector<16x128xbf16>
    %cst = arith.constant dense<0.000000e+00> : vector<128x128xf32>
    %2 = tpu.matmul %0, %1, %cst {dimension_numbers = #tpu.dot_dimension_numbers<[1], [0], [0], [1], [0, 0, 1, 1], [], []>} : vector<128x16xbf16>, vector<16x128xbf16>, vector<128x128xf32> -> vector<128x128xf32>
    %c0_3 = arith.constant 0 : index
    %c0_4 = arith.constant 0 : index
    %3 = vector.load %arg3[%c0_3, %c0_4] : memref<1x128xf32, #tpu.memory_space<vmem>>, vector<1x128xf32>
    %4 = vector.broadcast %3 : vector<1x128xf32> to vector<128x128xf32>
    %5 = arith.addf %2, %4 : vector<128x128xf32>
    %cst_5 = arith.constant 0.000000e+00 : f32
    %6 = vector.broadcast %cst_5 : f32 to vector<128x128xf32>
    %7 = arith.maximumf %5, %6 : vector<128x128xf32>
    %8 = arith.truncf %7 : vector<128x128xf32> to vector<128x128xbf16>
    %c0_6 = arith.constant 0 : index
    %c0_7 = arith.constant 0 : index
    %9 = vector.load %arg4[%c0_6, %c0_7] : memref<128x128xbf16, #tpu.memory_space<vmem>>, vector<128x128xbf16>
    %cst_8 = arith.constant dense<0.000000e+00> : vector<128x128xf32>
    %10 = tpu.matmul %8, %9, %cst_8 {dimension_numbers = #tpu.dot_dimension_numbers<[1], [0], [0], [1], [0, 0, 1, 1], [], []>} : vector<128x128xbf16>, vector<128x128xbf16>, vector<128x128xf32> -> vector<128x128xf32>
    %c0_9 = arith.constant 0 : index
    %c0_10 = arith.constant 0 : index
    %11 = vector.load %arg5[%c0_9, %c0_10] : memref<1x128xf32, #tpu.memory_space<vmem>>, vector<1x128xf32>
    %12 = vector.broadcast %11 : vector<1x128xf32> to vector<128x128xf32>
    %13 = arith.addf %10, %12 : vector<128x128xf32>
    %cst_11 = arith.constant 0.000000e+00 : f32
    %14 = vector.broadcast %cst_11 : f32 to vector<128x128xf32>
    %15 = arith.maximumf %13, %14 : vector<128x128xf32>
    %16 = arith.truncf %15 : vector<128x128xf32> to vector<128x128xbf16>
    %c0_12 = arith.constant 0 : index
    %c0_13 = arith.constant 0 : index
    %17 = vector.load %arg6[%c0_12, %c0_13] : memref<128x128xbf16, #tpu.memory_space<vmem>>, vector<128x128xbf16>
    %cst_14 = arith.constant dense<0.000000e+00> : vector<128x128xf32>
    %18 = tpu.matmul %16, %17, %cst_14 {dimension_numbers = #tpu.dot_dimension_numbers<[1], [0], [0], [1], [0, 0, 1, 1], [], []>} : vector<128x128xbf16>, vector<128x128xbf16>, vector<128x128xf32> -> vector<128x128xf32>
    %c0_15 = arith.constant 0 : index
    %c0_16 = arith.constant 0 : index
    %19 = vector.load %arg7[%c0_15, %c0_16] : memref<1x128xf32, #tpu.memory_space<vmem>>, vector<1x128xf32>
    %20 = vector.broadcast %19 : vector<1x128xf32> to vector<128x128xf32>
    %21 = arith.addf %18, %20 : vector<128x128xf32>
    %22 = math.tanh %21 : vector<128x128xf32>
    %23 = arith.truncf %22 : vector<128x128xf32> to vector<128x128xbf16>
    %c0_17 = arith.constant 0 : index
    %c0_18 = arith.constant 0 : index
    %24 = vector.load %arg8[%c0_17, %c0_18] : memref<128x128xbf16, #tpu.memory_space<vmem>>, vector<128x128xbf16>
    %cst_19 = arith.constant dense<0.000000e+00> : vector<128x128xf32>
    %25 = tpu.matmul %23, %24, %cst_19 {dimension_numbers = #tpu.dot_dimension_numbers<[1], [0], [0], [1], [0, 0, 1, 1], [], []>} : vector<128x128xbf16>, vector<128x128xbf16>, vector<128x128xf32> -> vector<128x128xf32>
    %c0_20 = arith.constant 0 : index
    %c0_21 = arith.constant 0 : index
    %26 = vector.load %arg9[%c0_20, %c0_21] : memref<1x128xf32, #tpu.memory_space<vmem>>, vector<1x128xf32>
    %27 = vector.broadcast %26 : vector<1x128xf32> to vector<128x128xf32>
    %28 = arith.addf %25, %27 : vector<128x128xf32>
    %29 = vector.extract_strided_slice %28 {offsets = [0, 0], sizes = [128, 4], strides = [1, 1]} : vector<128x128xf32> to vector<128x4xf32>
    %c0_22 = arith.constant 0 : index
    %c0_23 = arith.constant 0 : index
    %30 = vector.load %arg10[%c0_22, %c0_23] : memref<128x4xf32, #tpu.memory_space<vmem>>, vector<128x4xf32>
    tpu.vector_store %arg10[%c0_22, %c0_23], %29 {strides = array<i32>} : memref<128x4xf32, #tpu.memory_space<vmem>>, vector<128x4xf32>,
    return
  }
  func.func @transform_0(%arg0: i32) -> (i32, i32) {
    %c0_i32 = arith.constant 0 : i32
    %c0_i32_0 = arith.constant 0 : i32
    return %arg0, %c0_i32 : i32, i32
  }
  func.func @transform_1(%arg0: i32) -> (i32, i32) {
    %c0_i32 = arith.constant 0 : i32
    %c0_i32_0 = arith.constant 0 : i32
    %c0_i32_1 = arith.constant 0 : i32
    return %c0_i32, %c0_i32_0 : i32, i32
  }
  func.func @transform_2(%arg0: i32) -> (i32, i32) {
    %c0_i32 = arith.constant 0 : i32
    %c0_i32_0 = arith.constant 0 : i32
    %c0_i32_1 = arith.constant 0 : i32
    return %c0_i32, %c0_i32_0 : i32, i32
  }
  func.func @transform_3(%arg0: i32) -> (i32, i32) {
    %c0_i32 = arith.constant 0 : i32
    %c0_i32_0 = arith.constant 0 : i32
    %c0_i32_1 = arith.constant 0 : i32
    return %c0_i32, %c0_i32_0 : i32, i32
  }
  func.func @transform_4(%arg0: i32) -> (i32, i32) {
    %c0_i32 = arith.constant 0 : i32
    %c0_i32_0 = arith.constant 0 : i32
    %c0_i32_1 = arith.constant 0 : i32
    return %c0_i32, %c0_i32_0 : i32, i32
  }
  func.func @transform_5(%arg0: i32) -> (i32, i32) {
    %c0_i32 = arith.constant 0 : i32
    %c0_i32_0 = arith.constant 0 : i32
    %c0_i32_1 = arith.constant 0 : i32
    return %c0_i32, %c0_i32_0 : i32, i32
  }
  func.func @transform_6(%arg0: i32) -> (i32, i32) {
    %c0_i32 = arith.constant 0 : i32
    %c0_i32_0 = arith.constant 0 : i32
    %c0_i32_1 = arith.constant 0 : i32
    return %c0_i32, %c0_i32_0 : i32, i32
  }
  func.func @transform_7(%arg0: i32) -> (i32, i32) {
    %c0_i32 = arith.constant 0 : i32
    %c0_i32_0 = arith.constant 0 : i32
    %c0_i32_1 = arith.constant 0 : i32
    return %c0_i32, %c0_i32_0 : i32, i32
  }
  func.func @transform_8(%arg0: i32) -> (i32, i32) {
    %c0_i32 = arith.constant 0 : i32
    %c0_i32_0 = arith.constant 0 : i32
    %c0_i32_1 = arith.constant 0 : i32
    return %c0_i32, %c0_i32_0 : i32, i32
  }
  func.func @transform_9(%arg0: i32) -> (i32, i32) {
    %c0_i32 = arith.constant 0 : i32
    %c0_i32_0 = arith.constant 0 : i32
    return %arg0, %c0_i32 : i32, i32
  }
}

module attributes {stable_mosaic.version = 11 : i64} {
  func.func @_generator_kernel(%arg0: i32, %arg1: memref<128x16xbf16, #tpu.memory_space<vmem>>, %arg2: memref<16x128xbf16, #tpu.memory_space<vmem>>, %arg3: memref<1x128xf32, #tpu.memory_space<vmem>>, %arg4: memref<128x128xbf16, #tpu.memory_space<vmem>>, %arg5: memref<1x128xf32, #tpu.memory_space<vmem>>, %arg6: memref<128x128xbf16, #tpu.memory_space<vmem>>, %arg7: memref<1x128xf32, #tpu.memory_space<vmem>>, %arg8: memref<128x128xbf16, #tpu.memory_space<vmem>>, %arg9: memref<1x128xf32, #tpu.memory_space<vmem>>, %arg10: memref<128x4xf32, #tpu.memory_space<vmem>>) attributes {dimension_semantics = [#tpu.dimension_semantics<parallel>], iteration_bounds = array<i64: 4>, scalar_prefetch = 0 : i64, scratch_operands = 0 : i64, tpu.core_type = #tpu.core_type<tc>, window_params = [{transform_indices = @transform_0, window_bounds = array<i64: 128, 16>}, {pipeline_mode = #tpu.pipeline_mode<synchronous>, transform_indices = @transform_1, window_bounds = array<i64: 16, 128>}, {pipeline_mode = #tpu.pipeline_mode<synchronous>, transform_indices = @transform_2, window_bounds = array<i64: 1, 128>}, {pipeline_mode = #tpu.pipeline_mode<synchronous>, transform_indices = @transform_3, window_bounds = array<i64: 128, 128>}, {pipeline_mode = #tpu.pipeline_mode<synchronous>, transform_indices = @transform_4, window_bounds = array<i64: 1, 128>}, {pipeline_mode = #tpu.pipeline_mode<synchronous>, transform_indices = @transform_5, window_bounds = array<i64: 128, 128>}, {pipeline_mode = #tpu.pipeline_mode<synchronous>, transform_indices = @transform_6, window_bounds = array<i64: 1, 128>}, {pipeline_mode = #tpu.pipeline_mode<synchronous>, transform_indices = @transform_7, window_bounds = array<i64: 128, 128>}, {pipeline_mode = #tpu.pipeline_mode<synchronous>, transform_indices = @transform_8, window_bounds = array<i64: 1, 128>}, {transform_indices = @transform_9, window_bounds = array<i64: 128, 4>}]} {
    %c0 = arith.constant 0 : index
    %c0_0 = arith.constant 0 : index
    %0 = vector.load %arg1[%c0, %c0_0] : memref<128x16xbf16, #tpu.memory_space<vmem>>, vector<128x16xbf16>
    %c0_1 = arith.constant 0 : index
    %c0_2 = arith.constant 0 : index
    %1 = vector.load %arg2[%c0_1, %c0_2] : memref<16x128xbf16, #tpu.memory_space<vmem>>, vector<16x128xbf16>
    %cst = arith.constant dense<0.000000e+00> : vector<128x128xf32>
    %2 = tpu.matmul %0, %1, %cst {dimension_numbers = #tpu.dot_dimension_numbers<[1], [0], [0], [1], [0, 0, 1, 1], [], []>} : vector<128x16xbf16>, vector<16x128xbf16>, vector<128x128xf32> -> vector<128x128xf32>
    %c0_3 = arith.constant 0 : index
    %c0_4 = arith.constant 0 : index
    %3 = vector.load %arg3[%c0_3, %c0_4] : memref<1x128xf32, #tpu.memory_space<vmem>>, vector<1x128xf32>
    %4 = vector.broadcast %3 : vector<1x128xf32> to vector<128x128xf32>
    %5 = arith.addf %2, %4 : vector<128x128xf32>
    %cst_5 = arith.constant 0.000000e+00 : f32
    %6 = vector.broadcast %cst_5 : f32 to vector<128x128xf32>
    %7 = arith.maximumf %5, %6 : vector<128x128xf32>
    %8 = arith.truncf %7 : vector<128x128xf32> to vector<128x128xbf16>
    %c0_6 = arith.constant 0 : index
    %c0_7 = arith.constant 0 : index
    %9 = vector.load %arg4[%c0_6, %c0_7] : memref<128x128xbf16, #tpu.memory_space<vmem>>, vector<128x128xbf16>
    %cst_8 = arith.constant dense<0.000000e+00> : vector<128x128xf32>
    %10 = tpu.matmul %8, %9, %cst_8 {dimension_numbers = #tpu.dot_dimension_numbers<[1], [0], [0], [1], [0, 0, 1, 1], [], []>} : vector<128x128xbf16>, vector<128x128xbf16>, vector<128x128xf32> -> vector<128x128xf32>
    %c0_9 = arith.constant 0 : index
    %c0_10 = arith.constant 0 : index
    %11 = vector.load %arg5[%c0_9, %c0_10] : memref<1x128xf32, #tpu.memory_space<vmem>>, vector<1x128xf32>
    %12 = vector.broadcast %11 : vector<1x128xf32> to vector<128x128xf32>
    %13 = arith.addf %10, %12 : vector<128x128xf32>
    %cst_11 = arith.constant 0.000000e+00 : f32
    %14 = vector.broadcast %cst_11 : f32 to vector<128x128xf32>
    %15 = arith.maximumf %13, %14 : vector<128x128xf32>
    %16 = arith.truncf %15 : vector<128x128xf32> to vector<128x128xbf16>
    %c0_12 = arith.constant 0 : index
    %c0_13 = arith.constant 0 : index
    %17 = vector.load %arg6[%c0_12, %c0_13] : memref<128x128xbf16, #tpu.memory_space<vmem>>, vector<128x128xbf16>
    %cst_14 = arith.constant dense<0.000000e+00> : vector<128x128xf32>
    %18 = tpu.matmul %16, %17, %cst_14 {dimension_numbers = #tpu.dot_dimension_numbers<[1], [0], [0], [1], [0, 0, 1, 1], [], []>} : vector<128x128xbf16>, vector<128x128xbf16>, vector<128x128xf32> -> vector<128x128xf32>
    %c0_15 = arith.constant 0 : index
    %c0_16 = arith.constant 0 : index
    %19 = vector.load %arg7[%c0_15, %c0_16] : memref<1x128xf32, #tpu.memory_space<vmem>>, vector<1x128xf32>
    %20 = vector.broadcast %19 : vector<1x128xf32> to vector<128x128xf32>
    %21 = arith.addf %18, %20 : vector<128x128xf32>
    %22 = math.tanh %21 : vector<128x128xf32>
    %23 = arith.truncf %22 : vector<128x128xf32> to vector<128x128xbf16>
    %c0_17 = arith.constant 0 : index
    %c0_18 = arith.constant 0 : index
    %24 = vector.load %arg8[%c0_17, %c0_18] : memref<128x128xbf16, #tpu.memory_space<vmem>>, vector<128x128xbf16>
    %cst_19 = arith.constant dense<0.000000e+00> : vector<128x128xf32>
    %25 = tpu.matmul %23, %24, %cst_19 {dimension_numbers = #tpu.dot_dimension_numbers<[1], [0], [0], [1], [0, 0, 1, 1], [], []>} : vector<128x128xbf16>, vector<128x128xbf16>, vector<128x128xf32> -> vector<128x128xf32>
    %c0_20 = arith.constant 0 : index
    %c0_21 = arith.constant 0 : index
    %26 = vector.load %arg9[%c0_20, %c0_21] : memref<1x128xf32, #tpu.memory_space<vmem>>, vector<1x128xf32>
    %27 = vector.broadcast %26 : vector<1x128xf32> to vector<128x128xf32>
    %28 = arith.addf %25, %27 : vector<128x128xf32>
    %29 = vector.extract_strided_slice %28 {offsets = [0, 0], sizes = [128, 4], strides = [1, 1]} : vector<128x128xf32> to vector<128x4xf32>
    %c0_22 = arith.constant 0 : index
    %c0_23 = arith.constant 0 : index
    %30 = vector.load %arg10[%c0_22, %c0_23] : memref<128x4xf32, #tpu.memory_space<vmem>>, vector<128x4xf32>
    tpu.vector_store %arg10[%c0_22, %c0_23], %29 {strides = array<i32>} : memref<128x4xf32, #tpu.memory_space<vmem>>, vector<128x4xf32>,
    return
  }
  func.func @transform_0(%arg0: i32) -> (i32, i32) {
    %c0_i32 = arith.constant 0 : i32
    %c0_i32_0 = arith.constant 0 : i32
    return %arg0, %c0_i32 : i32, i32
  }
  func.func @transform_1(%arg0: i32) -> (i32, i32) {
    %c0_i32 = arith.constant 0 : i32
    %c0_i32_0 = arith.constant 0 : i32
    %c0_i32_1 = arith.constant 0 : i32
    return %c0_i32, %c0_i32_0 : i32, i32
  }
  func.func @transform_2(%arg0: i32) -> (i32, i32) {
    %c0_i32 = arith.constant 0 : i32
    %c0_i32_0 = arith.constant 0 : i32
    %c0_i32_1 = arith.constant 0 : i32
    return %c0_i32, %c0_i32_0 : i32, i32
  }
  func.func @transform_3(%arg0: i32) -> (i32, i32) {
    %c0_i32 = arith.constant 0 : i32
    %c0_i32_0 = arith.constant 0 : i32
    %c0_i32_1 = arith.constant 0 : i32
    return %c0_i32, %c0_i32_0 : i32, i32
  }
  func.func @transform_4(%arg0: i32) -> (i32, i32) {
    %c0_i32 = arith.constant 0 : i32
    %c0_i32_0 = arith.constant 0 : i32
    %c0_i32_1 = arith.constant 0 : i32
    return %c0_i32, %c0_i32_0 : i32, i32
  }
  func.func @transform_5(%arg0: i32) -> (i32, i32) {
    %c0_i32 = arith.constant 0 : i32
    %c0_i32_0 = arith.constant 0 : i32
    %c0_i32_1 = arith.constant 0 : i32
    return %c0_i32, %c0_i32_0 : i32, i32
  }
  func.func @transform_6(%arg0: i32) -> (i32, i32) {
    %c0_i32 = arith.constant 0 : i32
    %c0_i32_0 = arith.constant 0 : i32
    %c0_i32_1 = arith.constant 0 : i32
    return %c0_i32, %c0_i32_0 : i32, i32
  }
  func.func @transform_7(%arg0: i32) -> (i32, i32) {
    %c0_i32 = arith.constant 0 : i32
    %c0_i32_0 = arith.constant 0 : i32
    %c0_i32_1 = arith.constant 0 : i32
    return %c0_i32, %c0_i32_0 : i32, i32
  }
  func.func @transform_8(%arg0: i32) -> (i32, i32) {
    %c0_i32 = arith.constant 0 : i32
    %c0_i32_0 = arith.constant 0 : i32
    %c0_i32_1 = arith.constant 0 : i32
    return %c0_i32, %c0_i32_0 : i32, i32
  }
  func.func @transform_9(%arg0: i32) -> (i32, i32) {
    %c0_i32 = arith.constant 0 : i32
    %c0_i32_0 = arith.constant 0 : i32
    return %arg0, %c0_i32 : i32, i32
  }
}

</mosaic_0001>

<bundles_post_ra>
// kernel: _lambda_.1
= control target key start
LH: loop header
LB: loop body
LE: loop exit
PB: predicated region body
PF: predicated region fallthrough
CT: control target
= control target key end

     0   :  { %s1553_s30 = smov 0   ;;  %s1703_s0 = inlined_call_operand.vmem [shape: bf16[512,16], index: 0, kind: input, shape index: {}]   ;;  %s1704_s1 = inlined_call_operand.vmem [shape: bf16[16,128], index: 1, kind: input, shape index: {}]   ;;  %s1705_s2 = inlined_call_operand.vmem [shape: f32[1,128], index: 2, kind: input, shape index: {}]   ;;  %s1706_s3 = inlined_call_operand.vmem [shape: bf16[128,128], index: 3, kind: input, shape index: {}]   ;;  %s1707_s4 = inlined_call_operand.vmem [shape: f32[1,128], index: 4, kind: input, shape index: {}]   ;;  %s1708_s5 = inlined_call_operand.vmem [shape: bf16[128,128], index: 5, kind: input, shape index: {}]   ;;  %s1709_s6 = inlined_call_operand.vmem [shape: f32[1,128], index: 6, kind: input, shape index: {}]   ;;  %s1710_s7 = inlined_call_operand.vmem [shape: bf16[128,128], index: 7, kind: input, shape index: {}]   ;;  %s1711_s8 = inlined_call_operand.vmem [shape: f32[1,128], index: 8, kind: input, shape index: {}]   ;;  %s1712_s9 = inlined_call_operand.vmem [shape: f32[512,4], index: 9, kind: output, shape index: {}]  }
   0x1 LB: > { %s1179_s10 = sadd.s32 4294967295, %s1501_s30   ;;  %p1183_p0 = scmp.ge.s32.totalorder %s1501_s30, 1  ;;  %s1501_s30 = sphi %s1553_s30, %s19_s30  }
   0x2   : > { %p288_p1 = scmp.lt.s32.totalorder %s1501_s30, 5 }
   0x4   : > { %p289_p2 = pnand %p1183_p0, %p288_p1 }
   0x5   : > { %v1430_v0 = vld [vmem:[%s1704_s1] sm:$0xff] (!%p289_p2)   ;;  %s1184_s13 = sshll.u32 (!%p289_p2), %s1179_s10, 4  ;;  %v1440_v2 = vld [vmem:[%s1706_s3 + $0x8] sm:$0xff] (!%p289_p2)   ;;  %vm408_vm0 = vcmask (!%p289_p2), 130048   ;;  %v1441_v3 = vld [vmem:[%s1706_s3 + $0x10] sm:$0xff] (!%p289_p2)   ;;  %vm1106_vm1 = vcmask (!%p289_p2), 31744  }
   0x6   : > { %292 = sbr.rel (%p289_p2) target bundleno = 935 (0x3a7), region = 56  ;;  %p325_p3 = scmp.lt.s32.totalorder (!%p289_p2), %s1184_s13, 63  ;;  %1292 = vmatprep.subr.bf16.mxu0 (!%p289_p2), %v1430_v0  ;;  %v1439_v1 = vld [vmem:[%s1706_s3] sm:$0xff] (!%p289_p2)   ;;  %v1442_v7 = vld [vmem:[%s1706_s3 + $0x18] sm:$0xff] (!%p289_p2)   ;;  %v1444_v11 = vld [vmem:[%s1706_s3 + $0x28] sm:$0xff] (!%p289_p2)  }
   0x7   : > { %1293 = vmatpush3.bf16.msra.mxu0 (!%p289_p2), %v1430_v0  ;;  %1310 = vmatprep.subr.bf16.mxu1 (!%p289_p2), %v1439_v1  ;;  %v1443_v8 = vld [vmem:[%s1706_s3 + $0x20] sm:$0xff] (!%p289_p2)   ;;  %v1445_v15 = vld [vmem:[%s1706_s3 + $0x30] sm:$0xff] (!%p289_p2)   ;;  %v1446_v16 = vld [vmem:[%s1706_s3 + $0x38] sm:$0xff] (!%p289_p2)  }
   0x8   : > { %1311 = vmatpush3.bf16.msra.mxu1 (!%p289_p2), %v1439_v1  ;;  %v1447_v17 = vld [vmem:[%s1708_s5] sm:$0xff] (!%p289_p2)   ;;  %v1448_v18 = vld [vmem:[%s1708_s5 + $0x8] sm:$0xff] (!%p289_p2)   ;;  %v1449_v19 = vld [vmem:[%s1708_s5 + $0x10] sm:$0xff] (!%p289_p2)  }
   0x9   : > { %1312 = vmatprep.subr.bf16.mxu1 (!%p289_p2), %v1440_v2  ;;  %1342 = vmatprep.subr.bf16.mxu0 (!%p289_p2), %v1447_v17  ;;  %v1450_v20 = vld [vmem:[%s1708_s5 + $0x18] sm:$0xff] (!%p289_p2)   ;;  %v1451_v21 = vld [vmem:[%s1708_s5 + $0x20] sm:$0xff] (!%p289_p2)   ;;  %v1452_v22 = vld [vmem:[%s1708_s5 + $0x28] sm:$0xff] (!%p289_p2)  }
   0xa   : > { %v1188_v23 = vld [vmem:[%s1705_s2] ss:$0 sm:$0xff] (!%p289_p2) }
   0xc   : > { %1313 = vmatpush3.bf16.msra.mxu1 (!%p289_p2), %v1440_v2 }
   0xd   : > { %s1714_s13 = smov (!%p325_p3, %s1184_s13), 63  ;;  %1314 = vmatprep.subr.bf16.mxu1 %v1441_v3 }
   0xe   : > { %s1185_s18 = sshll.u32 %s1714_s13, 2  ;;  %s1187_s15 = sshll.u32 %s1714_s13, 3 }
   0xf   : > { %s328_s21 = scalar_lea.vmem %s1703_s0, %s1185_s18  ;;  %s1666_s20 = scalar_lea.vmem %s1712_s9, %s1187_s15 }
  0x10   : > { %v1431_v4 = vld [vmem:[%s328_s21] sm:$0xff]   ;;  %v1432_v5 = vld [vmem:[%s328_s21 + $0x8] sm:$0xff]   ;;  %v1433_v6 = vld [vmem:[%s328_s21 + $0x10] sm:$0xff]   ;;  %1315 = vmatpush3.bf16.msra.mxu1 %v1441_v3 }
  0x11   : > { %1294 = vmatprep.mubr.msk.bf16.mxu0 %vm408_vm0, %v1431_v4  ;;  %v1434_v9 = vld [vmem:[%s328_s21 + $0x18] sm:$0xff]   ;;  %1316 = vmatprep.subr.bf16.mxu1 %v1442_v7  ;;  %v1435_v10 = vld [vmem:[%s328_s21 + $0x20] sm:$0xff]   ;;  %v1436_v12 = vld [vmem:[%s328_s21 + $0x28] sm:$0xff]  }
  0x12   : > { %1295 = vmatmul.mubr.msk.bf16.vlgmr.msra.gmra.mrb[0].mxu0 %vm408_vm0, %v1432_v5  ;;  %v1437_v13 = vld [vmem:[%s328_s21 + $0x30] sm:$0xff]   ;;  %v1438_v14 = vld [vmem:[%s328_s21 + $0x38] sm:$0xff]  }
  0x13   : > { %1298 = vmatprep.mubr.msk.bf16.mxu0 %vm408_vm0, %v1433_v6  ;;  %1343 = vmatpush3.bf16.msra.mxu0 %v1447_v17  ;;  %v1454_v17 = vld [vmem:[%s1708_s5 + $0x38] sm:$0xff]  }
  0x14   : > { %1317 = vmatpush3.bf16.msra.mxu1 %v1442_v7  ;;  %1344 = vmatprep.subr.bf16.mxu0 %v1448_v18 }
  0x15   : > { %1318 = vmatprep.subr.bf16.mxu1 %v1443_v8 }
  0x17   : > { %1345 = vmatpush3.bf16.msra.mxu0 %v1448_v18  ;;  %v1455_v18 = vld [vmem:[%s1710_s7] sm:$0xff]  }
  0x18   : > { %1319 = vmatpush3.bf16.msra.mxu1 %v1443_v8  ;;  %1346 = vmatprep.subr.bf16.mxu0 %v1449_v19 }
  0x19   : > { %1320 = vmatprep.subr.bf16.mxu1 %v1444_v11 }
  0x1a   : > { %1299 = vmatmul.mubr.msk.bf16.gmra.mrb[4].mxu0 %vm408_vm0, %v1434_v9 }
  0x1b   : > { %1302 = vmatprep.mubr.msk.bf16.mxu0 %vm408_vm0, %v1435_v10  ;;  %1347 = vmatpush3.bf16.msra.mxu0 %v1449_v19  ;;  %v1456_v19 = vld [vmem:[%s1710_s7 + $0x8] sm:$0xff]  }
  0x1c   : > { %1321 = vmatpush3.bf16.msra.mxu1 %v1444_v11  ;;  %1348 = vmatprep.subr.bf16.mxu0 %v1450_v20 }
  0x1d   : > { %1322 = vmatprep.subr.bf16.mxu1 %v1445_v15 }
  0x1f   : > { %1349 = vmatpush3.bf16.msra.mxu0 %v1450_v20  ;;  %v1457_v20 = vld [vmem:[%s1710_s7 + $0x10] sm:$0xff]  }
  0x20   : > { %1323 = vmatpush3.bf16.msra.mxu1 %v1445_v15  ;;  %1350 = vmatprep.subr.bf16.mxu0 %v1451_v21 }
  0x21   : > { %1324 = vmatprep.subr.bf16.mxu1 %v1446_v16 }
  0x22   : > { %1303 = vmatmul.mubr.msk.bf16.gmra.mrb[8].mxu0 %vm408_vm0, %v1436_v12 }
  0x23   : > { %1306 = vmatprep.mubr.msk.bf16.mxu0 %vm408_vm0, %v1437_v13  ;;  %1351 = vmatpush3.bf16.msra.mxu0 %v1451_v21  ;;  %v1206_v21 = vld [vmem:[%s1707_s4] ss:$0 sm:$0xff] }
  0x24   : > { %1325 = vmatpush3.bf16.msra.mxu1 %v1446_v16  ;;  %1352 = vmatprep.subr.bf16.mxu0 %v1452_v22  ;;  %v1453_v16 = vld [vmem:[%s1708_s5 + $0x30] sm:$0xff]  }
  0x25   : > { %1406 = vmatprep.subr.bf16.mxu1 %v1455_v18 }
  0x27   : > { %1353 = vmatpush3.bf16.msra.mxu0 %v1452_v22 }
  0x28   : > { %1354 = vmatprep.subr.bf16.mxu0 %v1453_v16 }
  0x2a   : > { %1307 = vmatmul.mubr.msk.bf16.gmra.mrb[12].mxu0 %vm408_vm0, %v1438_v14 }
  0x2b   : > { %1355 = vmatpush3.bf16.msra.mxu0 %v1453_v16  ;;  %v1460_v16 = vld [vmem:[%s1710_s7 + $0x28] sm:$0xff]  }
  0x2c   : > { %1356 = vmatprep.subr.bf16.mxu0 %v1454_v17 }
  0x2f   : > { %1357 = vmatpush3.bf16.msra.mxu0 %v1454_v17  ;;  %v1461_v17 = vld [vmem:[%s1710_s7 + $0x30] sm:$0xff]  }
  0x30   : > { %1374 = vmatprep.subr.bf16.mxu0 %v1455_v18 }
  0xe5   : > { %v1296_v24 = vpop.f32.mrb[0].mxu0 }
  0xe6   : > { %v476_v25 = vadd.f32 %v1296_v24, %v1188_v23  ;;  %v467_v26 = vpop.f32.mrb[1].mxu0 }
  0xe7   : > { %v468_v27 = vadd.f32 %v1188_v23, %v467_v26  ;;  %v1297_v28 = vpop.f32.mrb[2].mxu0 }
  0xe8   : > { %v479_v29 = vadd.f32 %v1297_v28, %v1188_v23  ;;  %v470_v30 = vpop.f32.mrb[3].mxu0  ;;  %v532_v32 = vmax.f32 %v476_v25, 0.0 }
  0xe9   : > { %v471_v31 = vadd.f32 %v1188_v23, %v470_v30  ;;  %v530_v34 = vmax.f32 %v468_v27, 0.0 }
  0xea   : > { %v533_v33 = vmax.f32 %v479_v29, 0.0 }
  0xeb   : > { %v531_v35 = vmax.f32 %v471_v31, 0.0 }
  0xec   : > { %v547_v36 = vpack.c.bf16 %v533_v33, %v532_v32 }
  0xed   : > { %v1300_v37 = vpop.f32.mrb[4].mxu0  ;;  %v546_v38 = vpack.c.bf16 %v531_v35, %v530_v34 }
  0xee   : > { %v492_v39 = vadd.f32 %v1300_v37, %v1188_v23  ;;  %v483_v40 = vpop.f32.mrb[5].mxu0 }
  0xef   : > { %v484_v41 = vadd.f32 %v1188_v23, %v483_v40  ;;  %v1301_v42 = vpop.f32.mrb[6].mxu0  ;;  %1326 = vmatprep.mubr.bf16.mxu1 %v546_v38 }
  0xf0   : > { %v495_v43 = vadd.f32 %v1301_v42, %v1188_v23  ;;  %v486_v44 = vpop.f32.mrb[7].mxu0  ;;  %1327 = vmatmul.mubr.bf16.vlgmr.msra.gmra.mrb[0].mxu1 %v547_v36  ;;  %v536_v46 = vmax.f32 %v492_v39, 0.0 }
  0xf1   : > { %v487_v45 = vadd.f32 %v1188_v23, %v486_v44  ;;  %v534_v48 = vmax.f32 %v484_v41, 0.0  ;;  %1414 = vmatpush3.bf16.msra.mxu1 %v1455_v18 }
  0xf2   : > { %v537_v47 = vmax.f32 %v495_v43, 0.0  ;;  %1407 = vmatprep.subr.bf16.mxu1 %v1456_v19 }
  0xf3   : > { %v535_v49 = vmax.f32 %v487_v45, 0.0 }
  0xf4   : > { %v549_v50 = vpack.c.bf16 %v537_v47, %v536_v46 }
  0xf5   : > { %v548_v51 = vpack.c.bf16 %v535_v49, %v534_v48  ;;  %v1304_v52 = vpop.f32.mrb[8].mxu0  ;;  %1415 = vmatpush3.bf16.msra.mxu1 %v1456_v19 }
  0xf6   : > { %v508_v53 = vadd.f32 %v1304_v52, %v1188_v23  ;;  %v499_v54 = vpop.f32.mrb[9].mxu0  ;;  %1408 = vmatprep.subr.bf16.mxu1 %v1457_v20 }
  0xf7   : > { %v500_v55 = vadd.f32 %v1188_v23, %v499_v54  ;;  %v1305_v56 = vpop.f32.mrb[10].mxu0  ;;  %1330 = vmatprep.mubr.bf16.mxu1 %v548_v51 }
  0xf8   : > { %v511_v57 = vadd.f32 %v1305_v56, %v1188_v23  ;;  %v502_v58 = vpop.f32.mrb[11].mxu0  ;;  %1331 = vmatmul.mubr.bf16.gmra.mrb[4].mxu1 %v549_v50  ;;  %v540_v60 = vmax.f32 %v508_v53, 0.0 }
  0xf9   : > { %v503_v59 = vadd.f32 %v1188_v23, %v502_v58  ;;  %v538_v62 = vmax.f32 %v500_v55, 0.0  ;;  %1416 = vmatpush3.bf16.msra.mxu1 %v1457_v20 }
  0xfa   : > { %v541_v61 = vmax.f32 %v511_v57, 0.0 }
  0xfb   : > { %v539_v63 = vmax.f32 %v503_v59, 0.0 }
  0xfc   : > { %v551_v0 = vpack.c.bf16 %v541_v61, %v540_v60 }
  0xfd   : > { %v550_v1 = vpack.c.bf16 %v539_v63, %v538_v62  ;;  %v1308_v2 = vpop.f32.mrb[12].mxu0 }
  0xfe   : > { %v524_v3 = vadd.f32 %v1308_v2, %v1188_v23  ;;  %v515_v4 = vpop.f32.mrb[13].mxu0 }
  0xff   : > { %v516_v5 = vadd.f32 %v1188_v23, %v515_v4  ;;  %v1309_v6 = vpop.f32.mrb[14].mxu0  ;;  %1334 = vmatprep.mubr.bf16.mxu1 %v550_v1 }
 0x100   : > { %v527_v7 = vadd.f32 %v1309_v6, %v1188_v23  ;;  %v518_v8 = vpop.f32.mrb[15].mxu0  ;;  %1335 = vmatmul.mubr.bf16.gmra.mrb[8].mxu1 %v551_v0  ;;  %v544_v10 = vmax.f32 %v524_v3, 0.0 }
 0x101   : > { %v519_v9 = vadd.f32 %v1188_v23, %v518_v8  ;;  %v542_v12 = vmax.f32 %v516_v5, 0.0 }
 0x102   : > { %v545_v11 = vmax.f32 %v527_v7, 0.0 }
 0x103   : > { %v543_v13 = vmax.f32 %v519_v9, 0.0 }
 0x104   : > { %v553_v14 = vpack.c.bf16 %v545_v11, %v544_v10 }
 0x105   : > { %v552_v15 = vpack.c.bf16 %v543_v13, %v542_v12 }
 0x107   : > { %1338 = vmatprep.mubr.bf16.mxu1 %v552_v15  ;;  %v1459_v15 = vld [vmem:[%s1710_s7 + $0x20] sm:$0xff]  }
 0x108   : > { %1339 = vmatmul.mubr.bf16.gmra.mrb[12].mxu1 %v553_v14  ;;  %v1458_v14 = vld [vmem:[%s1710_s7 + $0x18] sm:$0xff]  }
 0x109   : > { %1409 = vmatprep.subr.bf16.mxu1 %v1458_v14 }
 0x10a   : > { %1417 = vmatpush3.bf16.msra.mxu1 %v1458_v14 }
 0x10b   : > { %1410 = vmatprep.subr.bf16.mxu1 %v1459_v15 }
 0x10e   : > { %1418 = vmatpush3.bf16.msra.mxu1 %v1459_v15 }
 0x10f   : > { %1411 = vmatprep.subr.bf16.mxu1 %v1460_v16 }
 0x112   : > { %1419 = vmatpush3.bf16.msra.mxu1 %v1460_v16 }
 0x113   : > { %1412 = vmatprep.subr.bf16.mxu1 %v1461_v17 }
 0x116   : > { %1420 = vmatpush3.bf16.msra.mxu1 %v1461_v17 }
 0x1c3   : > { %v1328_v22 = vpop.f32.mrb[0].mxu1 }
 0x1c4   : > { %v668_v23 = vadd.f32 %v1328_v22, %v1206_v21  ;;  %v659_v24 = vpop.f32.mrb[1].mxu1 }
 0x1c5   : > { %v660_v25 = vadd.f32 %v1206_v21, %v659_v24  ;;  %v1329_v26 = vpop.f32.mrb[2].mxu1 }
 0x1c6   : > { %v671_v27 = vadd.f32 %v1329_v26, %v1206_v21  ;;  %v662_v28 = vpop.f32.mrb[3].mxu1  ;;  %v724_v30 = vmax.f32 %v668_v23, 0.0 }
 0x1c7   : > { %v663_v29 = vadd.f32 %v1206_v21, %v662_v28  ;;  %v722_v32 = vmax.f32 %v660_v25, 0.0 }
 0x1c8   : > { %v725_v31 = vmax.f32 %v671_v27, 0.0 }
 0x1c9   : > { %v723_v33 = vmax.f32 %v663_v29, 0.0 }
 0x1ca   : > { %v739_v34 = vpack.c.bf16 %v725_v31, %v724_v30 }
 0x1cb   : > { %v738_v35 = vpack.c.bf16 %v723_v33, %v722_v32  ;;  %v1332_v36 = vpop.f32.mrb[4].mxu1 }
 0x1cc   : > { %v684_v37 = vadd.f32 %v1332_v36, %v1206_v21  ;;  %v675_v38 = vpop.f32.mrb[5].mxu1 }
 0x1cd   : > { %v676_v39 = vadd.f32 %v1206_v21, %v675_v38  ;;  %v1333_v40 = vpop.f32.mrb[6].mxu1  ;;  %1358 = vmatprep.mubr.bf16.mxu0 %v738_v35 }
 0x1ce   : > { %v687_v41 = vadd.f32 %v1333_v40, %v1206_v21  ;;  %v678_v42 = vpop.f32.mrb[7].mxu1  ;;  %1359 = vmatmul.mubr.bf16.vlgmr.msra.gmra.mrb[16].mxu0 %v739_v34  ;;  %v728_v44 = vmax.f32 %v684_v37, 0.0 }
 0x1cf   : > { %v679_v43 = vadd.f32 %v1206_v21, %v678_v42  ;;  %1375 = vmatpush3.bf16.msra.mxu0 %v1455_v18  ;;  %v726_v46 = vmax.f32 %v676_v39, 0.0  ;;  %v1462_v18 = vld [vmem:[%s1710_s7 + $0x38] sm:$0xff]  }
 0x1d0   : > { %v729_v45 = vmax.f32 %v687_v41, 0.0  ;;  %1376 = vmatprep.subr.bf16.mxu0 %v1456_v19  ;;  %1413 = vmatprep.subr.bf16.mxu1 %v1462_v18 }
 0x1d1   : > { %v727_v47 = vmax.f32 %v679_v43, 0.0  ;;  %1421 = vmatpush3.bf16.msra.mxu1 %v1462_v18 }
 0x1d2   : > { %v741_v48 = vpack.c.bf16 %v729_v45, %v728_v44 }
 0x1d3   : > { %v740_v49 = vpack.c.bf16 %v727_v47, %v726_v46  ;;  %v1336_v50 = vpop.f32.mrb[8].mxu1  ;;  %1377 = vmatpush3.bf16.msra.mxu0 %v1456_v19  ;;  %v1215_v19 = vld [vmem:[%s1709_s6] ss:$0 sm:$0xff] }
 0x1d4   : > { %v700_v51 = vadd.f32 %v1336_v50, %v1206_v21  ;;  %v691_v52 = vpop.f32.mrb[9].mxu1  ;;  %1378 = vmatprep.subr.bf16.mxu0 %v1457_v20 }
 0x1d5   : > { %v692_v53 = vadd.f32 %v1206_v21, %v691_v52  ;;  %v1337_v54 = vpop.f32.mrb[10].mxu1  ;;  %1362 = vmatprep.mubr.bf16.mxu0 %v740_v49 }
 0x1d6   : > { %v703_v55 = vadd.f32 %v1337_v54, %v1206_v21  ;;  %v694_v56 = vpop.f32.mrb[11].mxu1  ;;  %1363 = vmatmul.mubr.bf16.gmra.mrb[20].mxu0 %v741_v48  ;;  %v732_v58 = vmax.f32 %v700_v51, 0.0 }
 0x1d7   : > { %v695_v57 = vadd.f32 %v1206_v21, %v694_v56  ;;  %1379 = vmatpush3.bf16.msra.mxu0 %v1457_v20  ;;  %v730_v60 = vmax.f32 %v692_v53, 0.0 }
 0x1d8   : > { %v733_v59 = vmax.f32 %v703_v55, 0.0  ;;  %1380 = vmatprep.subr.bf16.mxu0 %v1458_v14 }
 0x1d9   : > { %v731_v61 = vmax.f32 %v695_v57, 0.0 }
 0x1da   : > { %v743_v62 = vpack.c.bf16 %v733_v59, %v732_v58 }
 0x1db   : > { %v742_v63 = vpack.c.bf16 %v731_v61, %v730_v60  ;;  %v1340_v0 = vpop.f32.mrb[12].mxu1  ;;  %1381 = vmatpush3.bf16.msra.mxu0 %v1458_v14 }
 0x1dc   : > { %v716_v1 = vadd.f32 %v1340_v0, %v1206_v21  ;;  %v707_v2 = vpop.f32.mrb[13].mxu1  ;;  %1382 = vmatprep.subr.bf16.mxu0 %v1459_v15 }
 0x1dd   : > { %v708_v3 = vadd.f32 %v1206_v21, %v707_v2  ;;  %v1341_v4 = vpop.f32.mrb[14].mxu1  ;;  %1366 = vmatprep.mubr.bf16.mxu0 %v742_v63 }
 0x1de   : > { %v719_v5 = vadd.f32 %v1341_v4, %v1206_v21  ;;  %v710_v6 = vpop.f32.mrb[15].mxu1  ;;  %1367 = vmatmul.mubr.bf16.gmra.mrb[24].mxu0 %v743_v62  ;;  %v736_v8 = vmax.f32 %v716_v1, 0.0 }
 0x1df   : > { %v711_v7 = vadd.f32 %v1206_v21, %v710_v6  ;;  %v734_v10 = vmax.f32 %v708_v3, 0.0  ;;  %1383 = vmatpush3.bf16.msra.mxu0 %v1459_v15 }
 0x1e0   : > { %v737_v9 = vmax.f32 %v719_v5, 0.0  ;;  %1384 = vmatprep.subr.bf16.mxu0 %v1460_v16 }
 0x1e1   : > { %v735_v11 = vmax.f32 %v711_v7, 0.0 }
 0x1e2   : > { %v745_v12 = vpack.c.bf16 %v737_v9, %v736_v8 }
 0x1e3   : > { %v744_v13 = vpack.c.bf16 %v735_v11, %v734_v10  ;;  %1385 = vmatpush3.bf16.msra.mxu0 %v1460_v16 }
 0x1e4   : > { %1386 = vmatprep.subr.bf16.mxu0 %v1461_v17 }
 0x1e5   : > { %1370 = vmatprep.mubr.bf16.mxu0 %v744_v13 }
 0x1e6   : > { %1371 = vmatmul.mubr.bf16.gmra.mrb[28].mxu0 %v745_v12  ;;  %v1224_v12 = vld [vmem:[%s1711_s8] ss:$0 sm:$0xff] }
 0x1e7   : > { %1387 = vmatpush3.bf16.msra.mxu0 %v1461_v17 }
 0x1e8   : > { %1388 = vmatprep.subr.bf16.mxu0 %v1462_v18 }
 0x1eb   : > { %1389 = vmatpush3.bf16.msra.mxu0 %v1462_v18 }
 0x2a1   : > { %v1360_v20 = vpop.f32.mrb[16].mxu0 }
 0x2a2   : > { %v860_v21 = vadd.f32 %v1360_v20, %v1215_v19  ;;  %v851_v22 = vpop.f32.mrb[17].mxu0 }
 0x2a3   : > { %v852_v23 = vadd.f32 %v1215_v19, %v851_v22  ;;  %v1361_v24 = vpop.f32.mrb[18].mxu0 }
 0x2a4   : > { %1463 = vtanh.f32 %v860_v21  ;;  %v863_v25 = vadd.f32 %v1361_v24, %v1215_v19  ;;  %v854_v26 = vpop.f32.mrb[19].mxu0 }
 0x2a5   : > { %1465 = vtanh.f32 %v852_v23  ;;  %v855_v27 = vadd.f32 %v1215_v19, %v854_v26 }
 0x2a6   : > { %1467 = vtanh.f32 %v863_v25 }
 0x2a7   : > { %1469 = vtanh.f32 %v855_v27 }
 0x2a9   : > { %v1364_v28 = vpop.f32.mrb[20].mxu0 }
 0x2aa   : > { %v876_v29 = vadd.f32 %v1364_v28, %v1215_v19  ;;  %v867_v30 = vpop.f32.mrb[21].mxu0 }
 0x2ab   : > { %v868_v31 = vadd.f32 %v1215_v19, %v867_v30  ;;  %v1365_v32 = vpop.f32.mrb[22].mxu0 }
 0x2ac   : > { %1471 = vtanh.f32 %v876_v29  ;;  %v879_v33 = vadd.f32 %v1365_v32, %v1215_v19  ;;  %v870_v34 = vpop.f32.mrb[23].mxu0 }
 0x2ad   : > { %1473 = vtanh.f32 %v868_v31  ;;  %v871_v35 = vadd.f32 %v1215_v19, %v870_v34 }
 0x2ae   : > { %v1464_v36 = vpop.eup %1463  ;;  %1475 = vtanh.f32 %v879_v33 }
 0x2af   : > { %v1466_v37 = vpop.eup %1465  ;;  %1477 = vtanh.f32 %v871_v35 }
 0x2b0   : > { %v1468_v38 = vpop.eup %1467 }
 0x2b1   : > { %v1470_v39 = vpop.eup %1469  ;;  %v1368_v40 = vpop.f32.mrb[24].mxu0  ;;  %v931_v41 = vpack.c.bf16 %v1468_v38, %v1464_v36 }
 0x2b2   : > { %v892_v42 = vadd.f32 %v1368_v40, %v1215_v19  ;;  %v883_v43 = vpop.f32.mrb[25].mxu0  ;;  %v930_v44 = vpack.c.bf16 %v1470_v39, %v1466_v37 }
 0x2b3   : > { %v884_v45 = vadd.f32 %v1215_v19, %v883_v43  ;;  %v1369_v46 = vpop.f32.mrb[26].mxu0 }
 0x2b4   : > { %1479 = vtanh.f32 %v892_v42  ;;  %v895_v47 = vadd.f32 %v1369_v46, %v1215_v19  ;;  %v886_v48 = vpop.f32.mrb[27].mxu0  ;;  %1390 = vmatprep.mubr.bf16.mxu0 %v930_v44 }
 0x2b5   : > { %1481 = vtanh.f32 %v884_v45  ;;  %v887_v49 = vadd.f32 %v1215_v19, %v886_v48  ;;  %1391 = vmatmul.mubr.bf16.vlgmr.msra.gmra.mrb[32].mxu0 %v931_v41 }
 0x2b6   : > { %v1472_v50 = vpop.eup %1471  ;;  %1483 = vtanh.f32 %v895_v47 }
 0x2b7   : > { %v1474_v51 = vpop.eup %1473  ;;  %1485 = vtanh.f32 %v887_v49 }
 0x2b8   : > { %v1476_v52 = vpop.eup %1475 }
 0x2b9   : > { %v1478_v53 = vpop.eup %1477  ;;  %v1372_v54 = vpop.f32.mrb[28].mxu0  ;;  %v933_v55 = vpack.c.bf16 %v1476_v52, %v1472_v50 }
 0x2ba   : > { %v908_v56 = vadd.f32 %v1372_v54, %v1215_v19  ;;  %v899_v57 = vpop.f32.mrb[29].mxu0  ;;  %v932_v58 = vpack.c.bf16 %v1478_v53, %v1474_v51 }
 0x2bb   : > { %v900_v59 = vadd.f32 %v1215_v19, %v899_v57  ;;  %v1373_v60 = vpop.f32.mrb[30].mxu0 }
 0x2bc   : > { %1487 = vtanh.f32 %v908_v56  ;;  %v911_v61 = vadd.f32 %v1373_v60, %v1215_v19  ;;  %v902_v62 = vpop.f32.mrb[31].mxu0  ;;  %1394 = vmatprep.mubr.bf16.mxu1 %v932_v58 }
 0x2bd   : > { %1489 = vtanh.f32 %v900_v59  ;;  %v903_v63 = vadd.f32 %v1215_v19, %v902_v62  ;;  %1395 = vmatmul.mubr.bf16.vlgmr.msra.gmra.mrb[16].mxu1 %v933_v55 }
 0x2be   : > { %v1480_v0 = vpop.eup %1479  ;;  %1491 = vtanh.f32 %v911_v61 }
 0x2bf   : > { %v1482_v1 = vpop.eup %1481  ;;  %1493 = vtanh.f32 %v903_v63 }
 0x2c0   : > { %v1484_v2 = vpop.eup %1483 }
 0x2c1   : > { %v1486_v3 = vpop.eup %1485  ;;  %v935_v4 = vpack.c.bf16 %v1484_v2, %v1480_v0 }
 0x2c2   : > { %v934_v5 = vpack.c.bf16 %v1486_v3, %v1482_v1 }
 0x2c4   : > { %1398 = vmatprep.mubr.bf16.mxu1 %v934_v5 }
 0x2c5   : > { %1399 = vmatmul.mubr.bf16.gmra.mrb[20].mxu1 %v935_v4 }
 0x2c6   : > { %v1488_v6 = vpop.eup %1487 }
 0x2c7   : > { %v1490_v7 = vpop.eup %1489 }
 0x2c8   : > { %v1492_v8 = vpop.eup %1491 }
 0x2c9   : > { %v1494_v9 = vpop.eup %1493  ;;  %v937_v10 = vpack.c.bf16 %v1492_v8, %v1488_v6 }
 0x2ca   : > { %v936_v11 = vpack.c.bf16 %v1494_v9, %v1490_v7 }
 0x2cc   : > { %1402 = vmatprep.mubr.bf16.mxu1 %v936_v11 }
 0x2cd   : > { %1403 = vmatmul.mubr.bf16.gmra.mrb[24].mxu1 %v937_v10 }
 0x388   : > { %v1392_v13 = vpop.f32.mrb[32].mxu0 }
 0x389   : > { %v1052_v14 = vadd.f32 %v1392_v13, %v1224_v12  ;;  %v1043_v15 = vpop.f32.mrb[33].mxu0 }
 0x38a   : > { %v1044_v16 = vadd.f32 %v1224_v12, %v1043_v15  ;;  %v1393_v17 = vpop.f32.mrb[34].mxu0 }
 0x38b   : > { %1109 = vst.msk [vmem:[%s1666_s20 + $0x10] sm:$0xff] %vm1106_vm1, %v1052_v14  ;;  %v1055_v18 = vadd.f32 %v1393_v17, %v1224_v12  ;;  %v1046_v19 = vpop.f32.mrb[35].mxu0 }
 0x38c   : > { %1107 = vst.msk [vmem:[%s1666_s20] sm:$0xff] %vm1106_vm1, %v1044_v16  ;;  %v1047_v20 = vadd.f32 %v1224_v12, %v1046_v19 }
 0x38d   : > { %1110 = vst.msk [vmem:[%s1666_s20 + $0x18] sm:$0xff] %vm1106_vm1, %v1055_v18 }
 0x38e   : > { %1108 = vst.msk [vmem:[%s1666_s20 + $0x8] sm:$0xff] %vm1106_vm1, %v1047_v20 }
 0x390   : > { %v1396_v21 = vpop.f32.mrb[16].mxu1 }
 0x391   : > { %v1068_v22 = vadd.f32 %v1396_v21, %v1224_v12  ;;  %v1059_v23 = vpop.f32.mrb[17].mxu1 }
 0x392   : > { %v1060_v24 = vadd.f32 %v1224_v12, %v1059_v23  ;;  %v1397_v25 = vpop.f32.mrb[18].mxu1 }
 0x393   : > { %1113 = vst.msk [vmem:[%s1666_s20 + $0x30] sm:$0xff] %vm1106_vm1, %v1068_v22  ;;  %v1071_v26 = vadd.f32 %v1397_v25, %v1224_v12  ;;  %v1062_v27 = vpop.f32.mrb[19].mxu1 }
 0x394   : > { %1111 = vst.msk [vmem:[%s1666_s20 + $0x20] sm:$0xff] %vm1106_vm1, %v1060_v24  ;;  %v1063_v28 = vadd.f32 %v1224_v12, %v1062_v27 }
 0x395   : > { %1114 = vst.msk [vmem:[%s1666_s20 + $0x38] sm:$0xff] %vm1106_vm1, %v1071_v26 }
 0x396   : > { %1112 = vst.msk [vmem:[%s1666_s20 + $0x28] sm:$0xff] %vm1106_vm1, %v1063_v28 }
 0x398   : > { %v1400_v29 = vpop.f32.mrb[20].mxu1 }
 0x399   : > { %v1084_v30 = vadd.f32 %v1400_v29, %v1224_v12  ;;  %v1075_v31 = vpop.f32.mrb[21].mxu1 }
 0x39a   : > { %v1076_v32 = vadd.f32 %v1224_v12, %v1075_v31  ;;  %v1401_v33 = vpop.f32.mrb[22].mxu1 }
 0x39b   : > { %1117 = vst.msk [vmem:[%s1666_s20 + $0x50] sm:$0xff] %vm1106_vm1, %v1084_v30  ;;  %v1087_v34 = vadd.f32 %v1401_v33, %v1224_v12  ;;  %v1078_v35 = vpop.f32.mrb[23].mxu1 }
 0x39c   : > { %1115 = vst.msk [vmem:[%s1666_s20 + $0x40] sm:$0xff] %vm1106_vm1, %v1076_v32  ;;  %v1079_v36 = vadd.f32 %v1224_v12, %v1078_v35 }
 0x39d   : > { %1118 = vst.msk [vmem:[%s1666_s20 + $0x58] sm:$0xff] %vm1106_vm1, %v1087_v34 }
 0x39e   : > { %1116 = vst.msk [vmem:[%s1666_s20 + $0x48] sm:$0xff] %vm1106_vm1, %v1079_v36 }
 0x3a0   : > { %v1404_v37 = vpop.f32.mrb[24].mxu1 }
 0x3a1   : > { %v1100_v38 = vadd.f32 %v1404_v37, %v1224_v12  ;;  %v1091_v39 = vpop.f32.mrb[25].mxu1 }
 0x3a2   : > { %v1092_v40 = vadd.f32 %v1224_v12, %v1091_v39  ;;  %v1405_v41 = vpop.f32.mrb[26].mxu1 }
 0x3a3   : > { %1121 = vst.msk [vmem:[%s1666_s20 + $0x70] sm:$0xff] %vm1106_vm1, %v1100_v38  ;;  %v1103_v42 = vadd.f32 %v1405_v41, %v1224_v12  ;;  %v1094_v43 = vpop.f32.mrb[27].mxu1 }
 0x3a4   : > { %1119 = vst.msk [vmem:[%s1666_s20 + $0x60] sm:$0xff] %vm1106_vm1, %v1092_v40  ;;  %v1095_v44 = vadd.f32 %v1224_v12, %v1094_v43 }
 0x3a5   : > { %1122 = vst.msk [vmem:[%s1666_s20 + $0x78] sm:$0xff] %vm1106_vm1, %v1103_v42 }
 0x3a6   : > { %1120 = vst.msk [vmem:[%s1666_s20 + $0x68] sm:$0xff] %vm1106_vm1, %v1095_v44 }
 0x3a7 PF: > { %s19_s30 = sadd.s32 1, %s1501_s30  }
 0x3a8   : > { %p16_p4 = scmp.ge.s32.totalorder %s19_s30, 6  }
 0x3aa   :  { %18 = sbr.rel (!%p16_p4) target bundleno = 1 (0x1), region = 86 }

// kernel: tpu_custom_call.1
= control target key start
LH: loop header
LB: loop body
LE: loop exit
PB: predicated region body
PF: predicated region fallthrough
CT: control target
= control target key end

     0   :  { %s1553_s30 = smov 0   ;;  %s1703_s0 = inlined_call_operand.vmem [shape: bf16[512,16], index: 0, kind: input, shape index: {}]   ;;  %s1704_s1 = inlined_call_operand.vmem [shape: bf16[16,128], index: 1, kind: input, shape index: {}]   ;;  %s1705_s2 = inlined_call_operand.vmem [shape: f32[1,128], index: 2, kind: input, shape index: {}]   ;;  %s1706_s3 = inlined_call_operand.vmem [shape: bf16[128,128], index: 3, kind: input, shape index: {}]   ;;  %s1707_s4 = inlined_call_operand.vmem [shape: f32[1,128], index: 4, kind: input, shape index: {}]   ;;  %s1708_s5 = inlined_call_operand.vmem [shape: bf16[128,128], index: 5, kind: input, shape index: {}]   ;;  %s1709_s6 = inlined_call_operand.vmem [shape: f32[1,128], index: 6, kind: input, shape index: {}]   ;;  %s1710_s7 = inlined_call_operand.vmem [shape: bf16[128,128], index: 7, kind: input, shape index: {}]   ;;  %s1711_s8 = inlined_call_operand.vmem [shape: f32[1,128], index: 8, kind: input, shape index: {}]   ;;  %s1712_s9 = inlined_call_operand.vmem [shape: f32[512,4], index: 9, kind: output, shape index: {}]  }
   0x1 LB: > { %s1179_s10 = sadd.s32 4294967295, %s1501_s30   ;;  %p1183_p0 = scmp.ge.s32.totalorder %s1501_s30, 1  ;;  %s1501_s30 = sphi %s1553_s30, %s19_s30  }
   0x2   : > { %p288_p1 = scmp.lt.s32.totalorder %s1501_s30, 5 }
   0x4   : > { %p289_p2 = pnand %p1183_p0, %p288_p1 }
   0x5   : > { %v1430_v0 = vld [vmem:[%s1704_s1] sm:$0xff] (!%p289_p2)   ;;  %s1184_s13 = sshll.u32 (!%p289_p2), %s1179_s10, 4  ;;  %v1440_v2 = vld [vmem:[%s1706_s3 + $0x8] sm:$0xff] (!%p289_p2)   ;;  %vm408_vm0 = vcmask (!%p289_p2), 130048   ;;  %v1441_v3 = vld [vmem:[%s1706_s3 + $0x10] sm:$0xff] (!%p289_p2)   ;;  %vm1106_vm1 = vcmask (!%p289_p2), 31744  }
   0x6   : > { %292 = sbr.rel (%p289_p2) target bundleno = 935 (0x3a7), region = 56  ;;  %p325_p3 = scmp.lt.s32.totalorder (!%p289_p2), %s1184_s13, 63  ;;  %1292 = vmatprep.subr.bf16.mxu0 (!%p289_p2), %v1430_v0  ;;  %v1439_v1 = vld [vmem:[%s1706_s3] sm:$0xff] (!%p289_p2)   ;;  %v1442_v7 = vld [vmem:[%s1706_s3 + $0x18] sm:$0xff] (!%p289_p2)   ;;  %v1444_v11 = vld [vmem:[%s1706_s3 + $0x28] sm:$0xff] (!%p289_p2)  }
   0x7   : > { %1293 = vmatpush3.bf16.msra.mxu0 (!%p289_p2), %v1430_v0  ;;  %1310 = vmatprep.subr.bf16.mxu1 (!%p289_p2), %v1439_v1  ;;  %v1443_v8 = vld [vmem:[%s1706_s3 + $0x20] sm:$0xff] (!%p289_p2)   ;;  %v1445_v15 = vld [vmem:[%s1706_s3 + $0x30] sm:$0xff] (!%p289_p2)   ;;  %v1446_v16 = vld [vmem:[%s1706_s3 + $0x38] sm:$0xff] (!%p289_p2)  }
   0x8   : > { %1311 = vmatpush3.bf16.msra.mxu1 (!%p289_p2), %v1439_v1  ;;  %v1447_v17 = vld [vmem:[%s1708_s5] sm:$0xff] (!%p289_p2)   ;;  %v1448_v18 = vld [vmem:[%s1708_s5 + $0x8] sm:$0xff] (!%p289_p2)   ;;  %v1449_v19 = vld [vmem:[%s1708_s5 + $0x10] sm:$0xff] (!%p289_p2)  }
   0x9   : > { %1312 = vmatprep.subr.bf16.mxu1 (!%p289_p2), %v1440_v2  ;;  %1342 = vmatprep.subr.bf16.mxu0 (!%p289_p2), %v1447_v17  ;;  %v1450_v20 = vld [vmem:[%s1708_s5 + $0x18] sm:$0xff] (!%p289_p2)   ;;  %v1451_v21 = vld [vmem:[%s1708_s5 + $0x20] sm:$0xff] (!%p289_p2)   ;;  %v1452_v22 = vld [vmem:[%s1708_s5 + $0x28] sm:$0xff] (!%p289_p2)  }
   0xa   : > { %v1188_v23 = vld [vmem:[%s1705_s2] ss:$0 sm:$0xff] (!%p289_p2) }
   0xc   : > { %1313 = vmatpush3.bf16.msra.mxu1 (!%p289_p2), %v1440_v2 }
   0xd   : > { %s1714_s13 = smov (!%p325_p3, %s1184_s13), 63  ;;  %1314 = vmatprep.subr.bf16.mxu1 %v1441_v3 }
   0xe   : > { %s1185_s18 = sshll.u32 %s1714_s13, 2  ;;  %s1187_s15 = sshll.u32 %s1714_s13, 3 }
   0xf   : > { %s328_s21 = scalar_lea.vmem %s1703_s0, %s1185_s18  ;;  %s1666_s20 = scalar_lea.vmem %s1712_s9, %s1187_s15 }
  0x10   : > { %v1431_v4 = vld [vmem:[%s328_s21] sm:$0xff]   ;;  %v1432_v5 = vld [vmem:[%s328_s21 + $0x8] sm:$0xff]   ;;  %v1433_v6 = vld [vmem:[%s328_s21 + $0x10] sm:$0xff]   ;;  %1315 = vmatpush3.bf16.msra.mxu1 %v1441_v3 }
  0x11   : > { %1294 = vmatprep.mubr.msk.bf16.mxu0 %vm408_vm0, %v1431_v4  ;;  %v1434_v9 = vld [vmem:[%s328_s21 + $0x18] sm:$0xff]   ;;  %1316 = vmatprep.subr.bf16.mxu1 %v1442_v7  ;;  %v1435_v10 = vld [vmem:[%s328_s21 + $0x20] sm:$0xff]   ;;  %v1436_v12 = vld [vmem:[%s328_s21 + $0x28] sm:$0xff]  }
  0x12   : > { %1295 = vmatmul.mubr.msk.bf16.vlgmr.msra.gmra.mrb[0].mxu0 %vm408_vm0, %v1432_v5  ;;  %v1437_v13 = vld [vmem:[%s328_s21 + $0x30] sm:$0xff]   ;;  %v1438_v14 = vld [vmem:[%s328_s21 + $0x38] sm:$0xff]  }
  0x13   : > { %1298 = vmatprep.mubr.msk.bf16.mxu0 %vm408_vm0, %v1433_v6  ;;  %1343 = vmatpush3.bf16.msra.mxu0 %v1447_v17  ;;  %v1454_v17 = vld [vmem:[%s1708_s5 + $0x38] sm:$0xff]  }
  0x14   : > { %1317 = vmatpush3.bf16.msra.mxu1 %v1442_v7  ;;  %1344 = vmatprep.subr.bf16.mxu0 %v1448_v18 }
  0x15   : > { %1318 = vmatprep.subr.bf16.mxu1 %v1443_v8 }
  0x17   : > { %1345 = vmatpush3.bf16.msra.mxu0 %v1448_v18  ;;  %v1455_v18 = vld [vmem:[%s1710_s7] sm:$0xff]  }
  0x18   : > { %1319 = vmatpush3.bf16.msra.mxu1 %v1443_v8  ;;  %1346 = vmatprep.subr.bf16.mxu0 %v1449_v19 }
  0x19   : > { %1320 = vmatprep.subr.bf16.mxu1 %v1444_v11 }
  0x1a   : > { %1299 = vmatmul.mubr.msk.bf16.gmra.mrb[4].mxu0 %vm408_vm0, %v1434_v9 }
  0x1b   : > { %1302 = vmatprep.mubr.msk.bf16.mxu0 %vm408_vm0, %v1435_v10  ;;  %1347 = vmatpush3.bf16.msra.mxu0 %v1449_v19  ;;  %v1456_v19 = vld [vmem:[%s1710_s7 + $0x8] sm:$0xff]  }
  0x1c   : > { %1321 = vmatpush3.bf16.msra.mxu1 %v1444_v11  ;;  %1348 = vmatprep.subr.bf16.mxu0 %v1450_v20 }
  0x1d   : > { %1322 = vmatprep.subr.bf16.mxu1 %v1445_v15 }
  0x1f   : > { %1349 = vmatpush3.bf16.msra.mxu0 %v1450_v20  ;;  %v1457_v20 = vld [vmem:[%s1710_s7 + $0x10] sm:$0xff]  }
  0x20   : > { %1323 = vmatpush3.bf16.msra.mxu1 %v1445_v15  ;;  %1350 = vmatprep.subr.bf16.mxu0 %v1451_v21 }
  0x21   : > { %1324 = vmatprep.subr.bf16.mxu1 %v1446_v16 }
  0x22   : > { %1303 = vmatmul.mubr.msk.bf16.gmra.mrb[8].mxu0 %vm408_vm0, %v1436_v12 }
  0x23   : > { %1306 = vmatprep.mubr.msk.bf16.mxu0 %vm408_vm0, %v1437_v13  ;;  %1351 = vmatpush3.bf16.msra.mxu0 %v1451_v21  ;;  %v1206_v21 = vld [vmem:[%s1707_s4] ss:$0 sm:$0xff] }
  0x24   : > { %1325 = vmatpush3.bf16.msra.mxu1 %v1446_v16  ;;  %1352 = vmatprep.subr.bf16.mxu0 %v1452_v22  ;;  %v1453_v16 = vld [vmem:[%s1708_s5 + $0x30] sm:$0xff]  }
  0x25   : > { %1406 = vmatprep.subr.bf16.mxu1 %v1455_v18 }
  0x27   : > { %1353 = vmatpush3.bf16.msra.mxu0 %v1452_v22 }
  0x28   : > { %1354 = vmatprep.subr.bf16.mxu0 %v1453_v16 }
  0x2a   : > { %1307 = vmatmul.mubr.msk.bf16.gmra.mrb[12].mxu0 %vm408_vm0, %v1438_v14 }
  0x2b   : > { %1355 = vmatpush3.bf16.msra.mxu0 %v1453_v16  ;;  %v1460_v16 = vld [vmem:[%s1710_s7 + $0x28] sm:$0xff]  }
  0x2c   : > { %1356 = vmatprep.subr.bf16.mxu0 %v1454_v17 }
  0x2f   : > { %1357 = vmatpush3.bf16.msra.mxu0 %v1454_v17  ;;  %v1461_v17 = vld [vmem:[%s1710_s7 + $0x30] sm:$0xff]  }
  0x30   : > { %1374 = vmatprep.subr.bf16.mxu0 %v1455_v18 }
  0xe5   : > { %v1296_v24 = vpop.f32.mrb[0].mxu0 }
  0xe6   : > { %v476_v25 = vadd.f32 %v1296_v24, %v1188_v23  ;;  %v467_v26 = vpop.f32.mrb[1].mxu0 }
  0xe7   : > { %v468_v27 = vadd.f32 %v1188_v23, %v467_v26  ;;  %v1297_v28 = vpop.f32.mrb[2].mxu0 }
  0xe8   : > { %v479_v29 = vadd.f32 %v1297_v28, %v1188_v23  ;;  %v470_v30 = vpop.f32.mrb[3].mxu0  ;;  %v532_v32 = vmax.f32 %v476_v25, 0.0 }
  0xe9   : > { %v471_v31 = vadd.f32 %v1188_v23, %v470_v30  ;;  %v530_v34 = vmax.f32 %v468_v27, 0.0 }
  0xea   : > { %v533_v33 = vmax.f32 %v479_v29, 0.0 }
  0xeb   : > { %v531_v35 = vmax.f32 %v471_v31, 0.0 }
  0xec   : > { %v547_v36 = vpack.c.bf16 %v533_v33, %v532_v32 }
  0xed   : > { %v1300_v37 = vpop.f32.mrb[4].mxu0  ;;  %v546_v38 = vpack.c.bf16 %v531_v35, %v530_v34 }
  0xee   : > { %v492_v39 = vadd.f32 %v1300_v37, %v1188_v23  ;;  %v483_v40 = vpop.f32.mrb[5].mxu0 }
  0xef   : > { %v484_v41 = vadd.f32 %v1188_v23, %v483_v40  ;;  %v1301_v42 = vpop.f32.mrb[6].mxu0  ;;  %1326 = vmatprep.mubr.bf16.mxu1 %v546_v38 }
  0xf0   : > { %v495_v43 = vadd.f32 %v1301_v42, %v1188_v23  ;;  %v486_v44 = vpop.f32.mrb[7].mxu0  ;;  %1327 = vmatmul.mubr.bf16.vlgmr.msra.gmra.mrb[0].mxu1 %v547_v36  ;;  %v536_v46 = vmax.f32 %v492_v39, 0.0 }
  0xf1   : > { %v487_v45 = vadd.f32 %v1188_v23, %v486_v44  ;;  %v534_v48 = vmax.f32 %v484_v41, 0.0  ;;  %1414 = vmatpush3.bf16.msra.mxu1 %v1455_v18 }
  0xf2   : > { %v537_v47 = vmax.f32 %v495_v43, 0.0  ;;  %1407 = vmatprep.subr.bf16.mxu1 %v1456_v19 }
  0xf3   : > { %v535_v49 = vmax.f32 %v487_v45, 0.0 }
  0xf4   : > { %v549_v50 = vpack.c.bf16 %v537_v47, %v536_v46 }
  0xf5   : > { %v548_v51 = vpack.c.bf16 %v535_v49, %v534_v48  ;;  %v1304_v52 = vpop.f32.mrb[8].mxu0  ;;  %1415 = vmatpush3.bf16.msra.mxu1 %v1456_v19 }
  0xf6   : > { %v508_v53 = vadd.f32 %v1304_v52, %v1188_v23  ;;  %v499_v54 = vpop.f32.mrb[9].mxu0  ;;  %1408 = vmatprep.subr.bf16.mxu1 %v1457_v20 }
  0xf7   : > { %v500_v55 = vadd.f32 %v1188_v23, %v499_v54  ;;  %v1305_v56 = vpop.f32.mrb[10].mxu0  ;;  %1330 = vmatprep.mubr.bf16.mxu1 %v548_v51 }
  0xf8   : > { %v511_v57 = vadd.f32 %v1305_v56, %v1188_v23  ;;  %v502_v58 = vpop.f32.mrb[11].mxu0  ;;  %1331 = vmatmul.mubr.bf16.gmra.mrb[4].mxu1 %v549_v50  ;;  %v540_v60 = vmax.f32 %v508_v53, 0.0 }
  0xf9   : > { %v503_v59 = vadd.f32 %v1188_v23, %v502_v58  ;;  %v538_v62 = vmax.f32 %v500_v55, 0.0  ;;  %1416 = vmatpush3.bf16.msra.mxu1 %v1457_v20 }
  0xfa   : > { %v541_v61 = vmax.f32 %v511_v57, 0.0 }
  0xfb   : > { %v539_v63 = vmax.f32 %v503_v59, 0.0 }
  0xfc   : > { %v551_v0 = vpack.c.bf16 %v541_v61, %v540_v60 }
  0xfd   : > { %v550_v1 = vpack.c.bf16 %v539_v63, %v538_v62  ;;  %v1308_v2 = vpop.f32.mrb[12].mxu0 }
  0xfe   : > { %v524_v3 = vadd.f32 %v1308_v2, %v1188_v23  ;;  %v515_v4 = vpop.f32.mrb[13].mxu0 }
  0xff   : > { %v516_v5 = vadd.f32 %v1188_v23, %v515_v4  ;;  %v1309_v6 = vpop.f32.mrb[14].mxu0  ;;  %1334 = vmatprep.mubr.bf16.mxu1 %v550_v1 }
 0x100   : > { %v527_v7 = vadd.f32 %v1309_v6, %v1188_v23  ;;  %v518_v8 = vpop.f32.mrb[15].mxu0  ;;  %1335 = vmatmul.mubr.bf16.gmra.mrb[8].mxu1 %v551_v0  ;;  %v544_v10 = vmax.f32 %v524_v3, 0.0 }
 0x101   : > { %v519_v9 = vadd.f32 %v1188_v23, %v518_v8  ;;  %v542_v12 = vmax.f32 %v516_v5, 0.0 }
 0x102   : > { %v545_v11 = vmax.f32 %v527_v7, 0.0 }
 0x103   : > { %v543_v13 = vmax.f32 %v519_v9, 0.0 }
 0x104   : > { %v553_v14 = vpack.c.bf16 %v545_v11, %v544_v10 }
 0x105   : > { %v552_v15 = vpack.c.bf16 %v543_v13, %v542_v12 }
 0x107   : > { %1338 = vmatprep.mubr.bf16.mxu1 %v552_v15  ;;  %v1459_v15 = vld [vmem:[%s1710_s7 + $0x20] sm:$0xff]  }
 0x108   : > { %1339 = vmatmul.mubr.bf16.gmra.mrb[12].mxu1 %v553_v14  ;;  %v1458_v14 = vld [vmem:[%s1710_s7 + $0x18] sm:$0xff]  }
 0x109   : > { %1409 = vmatprep.subr.bf16.mxu1 %v1458_v14 }
 0x10a   : > { %1417 = vmatpush3.bf16.msra.mxu1 %v1458_v14 }
 0x10b   : > { %1410 = vmatprep.subr.bf16.mxu1 %v1459_v15 }
 0x10e   : > { %1418 = vmatpush3.bf16.msra.mxu1 %v1459_v15 }
 0x10f   : > { %1411 = vmatprep.subr.bf16.mxu1 %v1460_v16 }
 0x112   : > { %1419 = vmatpush3.bf16.msra.mxu1 %v1460_v16 }
 0x113   : > { %1412 = vmatprep.subr.bf16.mxu1 %v1461_v17 }
 0x116   : > { %1420 = vmatpush3.bf16.msra.mxu1 %v1461_v17 }
 0x1c3   : > { %v1328_v22 = vpop.f32.mrb[0].mxu1 }
 0x1c4   : > { %v668_v23 = vadd.f32 %v1328_v22, %v1206_v21  ;;  %v659_v24 = vpop.f32.mrb[1].mxu1 }
 0x1c5   : > { %v660_v25 = vadd.f32 %v1206_v21, %v659_v24  ;;  %v1329_v26 = vpop.f32.mrb[2].mxu1 }
 0x1c6   : > { %v671_v27 = vadd.f32 %v1329_v26, %v1206_v21  ;;  %v662_v28 = vpop.f32.mrb[3].mxu1  ;;  %v724_v30 = vmax.f32 %v668_v23, 0.0 }
 0x1c7   : > { %v663_v29 = vadd.f32 %v1206_v21, %v662_v28  ;;  %v722_v32 = vmax.f32 %v660_v25, 0.0 }
 0x1c8   : > { %v725_v31 = vmax.f32 %v671_v27, 0.0 }
 0x1c9   : > { %v723_v33 = vmax.f32 %v663_v29, 0.0 }
 0x1ca   : > { %v739_v34 = vpack.c.bf16 %v725_v31, %v724_v30 }
 0x1cb   : > { %v738_v35 = vpack.c.bf16 %v723_v33, %v722_v32  ;;  %v1332_v36 = vpop.f32.mrb[4].mxu1 }
 0x1cc   : > { %v684_v37 = vadd.f32 %v1332_v36, %v1206_v21  ;;  %v675_v38 = vpop.f32.mrb[5].mxu1 }
 0x1cd   : > { %v676_v39 = vadd.f32 %v1206_v21, %v675_v38  ;;  %v1333_v40 = vpop.f32.mrb[6].mxu1  ;;  %1358 = vmatprep.mubr.bf16.mxu0 %v738_v35 }
 0x1ce   : > { %v687_v41 = vadd.f32 %v1333_v40, %v1206_v21  ;;  %v678_v42 = vpop.f32.mrb[7].mxu1  ;;  %1359 = vmatmul.mubr.bf16.vlgmr.msra.gmra.mrb[16].mxu0 %v739_v34  ;;  %v728_v44 = vmax.f32 %v684_v37, 0.0 }
 0x1cf   : > { %v679_v43 = vadd.f32 %v1206_v21, %v678_v42  ;;  %1375 = vmatpush3.bf16.msra.mxu0 %v1455_v18  ;;  %v726_v46 = vmax.f32 %v676_v39, 0.0  ;;  %v1462_v18 = vld [vmem:[%s1710_s7 + $0x38] sm:$0xff]  }
 0x1d0   : > { %v729_v45 = vmax.f32 %v687_v41, 0.0  ;;  %1376 = vmatprep.subr.bf16.mxu0 %v1456_v19  ;;  %1413 = vmatprep.subr.bf16.mxu1 %v1462_v18 }
 0x1d1   : > { %v727_v47 = vmax.f32 %v679_v43, 0.0  ;;  %1421 = vmatpush3.bf16.msra.mxu1 %v1462_v18 }
 0x1d2   : > { %v741_v48 = vpack.c.bf16 %v729_v45, %v728_v44 }
 0x1d3   : > { %v740_v49 = vpack.c.bf16 %v727_v47, %v726_v46  ;;  %v1336_v50 = vpop.f32.mrb[8].mxu1  ;;  %1377 = vmatpush3.bf16.msra.mxu0 %v1456_v19  ;;  %v1215_v19 = vld [vmem:[%s1709_s6] ss:$0 sm:$0xff] }
 0x1d4   : > { %v700_v51 = vadd.f32 %v1336_v50, %v1206_v21  ;;  %v691_v52 = vpop.f32.mrb[9].mxu1  ;;  %1378 = vmatprep.subr.bf16.mxu0 %v1457_v20 }
 0x1d5   : > { %v692_v53 = vadd.f32 %v1206_v21, %v691_v52  ;;  %v1337_v54 = vpop.f32.mrb[10].mxu1  ;;  %1362 = vmatprep.mubr.bf16.mxu0 %v740_v49 }
 0x1d6   : > { %v703_v55 = vadd.f32 %v1337_v54, %v1206_v21  ;;  %v694_v56 = vpop.f32.mrb[11].mxu1  ;;  %1363 = vmatmul.mubr.bf16.gmra.mrb[20].mxu0 %v741_v48  ;;  %v732_v58 = vmax.f32 %v700_v51, 0.0 }
 0x1d7   : > { %v695_v57 = vadd.f32 %v1206_v21, %v694_v56  ;;  %1379 = vmatpush3.bf16.msra.mxu0 %v1457_v20  ;;  %v730_v60 = vmax.f32 %v692_v53, 0.0 }
 0x1d8   : > { %v733_v59 = vmax.f32 %v703_v55, 0.0  ;;  %1380 = vmatprep.subr.bf16.mxu0 %v1458_v14 }
 0x1d9   : > { %v731_v61 = vmax.f32 %v695_v57, 0.0 }
 0x1da   : > { %v743_v62 = vpack.c.bf16 %v733_v59, %v732_v58 }
 0x1db   : > { %v742_v63 = vpack.c.bf16 %v731_v61, %v730_v60  ;;  %v1340_v0 = vpop.f32.mrb[12].mxu1  ;;  %1381 = vmatpush3.bf16.msra.mxu0 %v1458_v14 }
 0x1dc   : > { %v716_v1 = vadd.f32 %v1340_v0, %v1206_v21  ;;  %v707_v2 = vpop.f32.mrb[13].mxu1  ;;  %1382 = vmatprep.subr.bf16.mxu0 %v1459_v15 }
 0x1dd   : > { %v708_v3 = vadd.f32 %v1206_v21, %v707_v2  ;;  %v1341_v4 = vpop.f32.mrb[14].mxu1  ;;  %1366 = vmatprep.mubr.bf16.mxu0 %v742_v63 }
 0x1de   : > { %v719_v5 = vadd.f32 %v1341_v4, %v1206_v21  ;;  %v710_v6 = vpop.f32.mrb[15].mxu1  ;;  %1367 = vmatmul.mubr.bf16.gmra.mrb[24].mxu0 %v743_v62  ;;  %v736_v8 = vmax.f32 %v716_v1, 0.0 }
 0x1df   : > { %v711_v7 = vadd.f32 %v1206_v21, %v710_v6  ;;  %v734_v10 = vmax.f32 %v708_v3, 0.0  ;;  %1383 = vmatpush3.bf16.msra.mxu0 %v1459_v15 }
 0x1e0   : > { %v737_v9 = vmax.f32 %v719_v5, 0.0  ;;  %1384 = vmatprep.subr.bf16.mxu0 %v1460_v16 }
 0x1e1   : > { %v735_v11 = vmax.f32 %v711_v7, 0.0 }
 0x1e2   : > { %v745_v12 = vpack.c.bf16 %v737_v9, %v736_v8 }
 0x1e3   : > { %v744_v13 = vpack.c.bf16 %v735_v11, %v734_v10  ;;  %1385 = vmatpush3.bf16.msra.mxu0 %v1460_v16 }
 0x1e4   : > { %1386 = vmatprep.subr.bf16.mxu0 %v1461_v17 }
 0x1e5   : > { %1370 = vmatprep.mubr.bf16.mxu0 %v744_v13 }
 0x1e6   : > { %1371 = vmatmul.mubr.bf16.gmra.mrb[28].mxu0 %v745_v12  ;;  %v1224_v12 = vld [vmem:[%s1711_s8] ss:$0 sm:$0xff] }
 0x1e7   : > { %1387 = vmatpush3.bf16.msra.mxu0 %v1461_v17 }
 0x1e8   : > { %1388 = vmatprep.subr.bf16.mxu0 %v1462_v18 }
 0x1eb   : > { %1389 = vmatpush3.bf16.msra.mxu0 %v1462_v18 }
 0x2a1   : > { %v1360_v20 = vpop.f32.mrb[16].mxu0 }
 0x2a2   : > { %v860_v21 = vadd.f32 %v1360_v20, %v1215_v19  ;;  %v851_v22 = vpop.f32.mrb[17].mxu0 }
 0x2a3   : > { %v852_v23 = vadd.f32 %v1215_v19, %v851_v22  ;;  %v1361_v24 = vpop.f32.mrb[18].mxu0 }
 0x2a4   : > { %1463 = vtanh.f32 %v860_v21  ;;  %v863_v25 = vadd.f32 %v1361_v24, %v1215_v19  ;;  %v854_v26 = vpop.f32.mrb[19].mxu0 }
 0x2a5   : > { %1465 = vtanh.f32 %v852_v23  ;;  %v855_v27 = vadd.f32 %v1215_v19, %v854_v26 }
 0x2a6   : > { %1467 = vtanh.f32 %v863_v25 }
 0x2a7   : > { %1469 = vtanh.f32 %v855_v27 }
 0x2a9   : > { %v1364_v28 = vpop.f32.mrb[20].mxu0 }
 0x2aa   : > { %v876_v29 = vadd.f32 %v1364_v28, %v1215_v19  ;;  %v867_v30 = vpop.f32.mrb[21].mxu0 }
 0x2ab   : > { %v868_v31 = vadd.f32 %v1215_v19, %v867_v30  ;;  %v1365_v32 = vpop.f32.mrb[22].mxu0 }
 0x2ac   : > { %1471 = vtanh.f32 %v876_v29  ;;  %v879_v33 = vadd.f32 %v1365_v32, %v1215_v19  ;;  %v870_v34 = vpop.f32.mrb[23].mxu0 }
 0x2ad   : > { %1473 = vtanh.f32 %v868_v31  ;;  %v871_v35 = vadd.f32 %v1215_v19, %v870_v34 }
 0x2ae   : > { %v1464_v36 = vpop.eup %1463  ;;  %1475 = vtanh.f32 %v879_v33 }
 0x2af   : > { %v1466_v37 = vpop.eup %1465  ;;  %1477 = vtanh.f32 %v871_v35 }
 0x2b0   : > { %v1468_v38 = vpop.eup %1467 }
 0x2b1   : > { %v1470_v39 = vpop.eup %1469  ;;  %v1368_v40 = vpop.f32.mrb[24].mxu0  ;;  %v931_v41 = vpack.c.bf16 %v1468_v38, %v1464_v36 }
 0x2b2   : > { %v892_v42 = vadd.f32 %v1368_v40, %v1215_v19  ;;  %v883_v43 = vpop.f32.mrb[25].mxu0  ;;  %v930_v44 = vpack.c.bf16 %v1470_v39, %v1466_v37 }
 0x2b3   : > { %v884_v45 = vadd.f32 %v1215_v19, %v883_v43  ;;  %v1369_v46 = vpop.f32.mrb[26].mxu0 }
 0x2b4   : > { %1479 = vtanh.f32 %v892_v42  ;;  %v895_v47 = vadd.f32 %v1369_v46, %v1215_v19  ;;  %v886_v48 = vpop.f32.mrb[27].mxu0  ;;  %1390 = vmatprep.mubr.bf16.mxu0 %v930_v44 }
 0x2b5   : > { %1481 = vtanh.f32 %v884_v45  ;;  %v887_v49 = vadd.f32 %v1215_v19, %v886_v48  ;;  %1391 = vmatmul.mubr.bf16.vlgmr.msra.gmra.mrb[32].mxu0 %v931_v41 }
 0x2b6   : > { %v1472_v50 = vpop.eup %1471  ;;  %1483 = vtanh.f32 %v895_v47 }
 0x2b7   : > { %v1474_v51 = vpop.eup %1473  ;;  %1485 = vtanh.f32 %v887_v49 }
 0x2b8   : > { %v1476_v52 = vpop.eup %1475 }
 0x2b9   : > { %v1478_v53 = vpop.eup %1477  ;;  %v1372_v54 = vpop.f32.mrb[28].mxu0  ;;  %v933_v55 = vpack.c.bf16 %v1476_v52, %v1472_v50 }
 0x2ba   : > { %v908_v56 = vadd.f32 %v1372_v54, %v1215_v19  ;;  %v899_v57 = vpop.f32.mrb[29].mxu0  ;;  %v932_v58 = vpack.c.bf16 %v1478_v53, %v1474_v51 }
 0x2bb   : > { %v900_v59 = vadd.f32 %v1215_v19, %v899_v57  ;;  %v1373_v60 = vpop.f32.mrb[30].mxu0 }
 0x2bc   : > { %1487 = vtanh.f32 %v908_v56  ;;  %v911_v61 = vadd.f32 %v1373_v60, %v1215_v19  ;;  %v902_v62 = vpop.f32.mrb[31].mxu0  ;;  %1394 = vmatprep.mubr.bf16.mxu1 %v932_v58 }
 0x2bd   : > { %1489 = vtanh.f32 %v900_v59  ;;  %v903_v63 = vadd.f32 %v1215_v19, %v902_v62  ;;  %1395 = vmatmul.mubr.bf16.vlgmr.msra.gmra.mrb[16].mxu1 %v933_v55 }
 0x2be   : > { %v1480_v0 = vpop.eup %1479  ;;  %1491 = vtanh.f32 %v911_v61 }
 0x2bf   : > { %v1482_v1 = vpop.eup %1481  ;;  %1493 = vtanh.f32 %v903_v63 }
 0x2c0   : > { %v1484_v2 = vpop.eup %1483 }
 0x2c1   : > { %v1486_v3 = vpop.eup %1485  ;;  %v935_v4 = vpack.c.bf16 %v1484_v2, %v1480_v0 }
 0x2c2   : > { %v934_v5 = vpack.c.bf16 %v1486_v3, %v1482_v1 }
 0x2c4   : > { %1398 = vmatprep.mubr.bf16.mxu1 %v934_v5 }
 0x2c5   : > { %1399 = vmatmul.mubr.bf16.gmra.mrb[20].mxu1 %v935_v4 }
 0x2c6   : > { %v1488_v6 = vpop.eup %1487 }
 0x2c7   : > { %v1490_v7 = vpop.eup %1489 }
 0x2c8   : > { %v1492_v8 = vpop.eup %1491 }
 0x2c9   : > { %v1494_v9 = vpop.eup %1493  ;;  %v937_v10 = vpack.c.bf16 %v1492_v8, %v1488_v6 }
 0x2ca   : > { %v936_v11 = vpack.c.bf16 %v1494_v9, %v1490_v7 }
 0x2cc   : > { %1402 = vmatprep.mubr.bf16.mxu1 %v936_v11 }
 0x2cd   : > { %1403 = vmatmul.mubr.bf16.gmra.mrb[24].mxu1 %v937_v10 }
 0x388   : > { %v1392_v13 = vpop.f32.mrb[32].mxu0 }
 0x389   : > { %v1052_v14 = vadd.f32 %v1392_v13, %v1224_v12  ;;  %v1043_v15 = vpop.f32.mrb[33].mxu0 }
 0x38a   : > { %v1044_v16 = vadd.f32 %v1224_v12, %v1043_v15  ;;  %v1393_v17 = vpop.f32.mrb[34].mxu0 }
 0x38b   : > { %1109 = vst.msk [vmem:[%s1666_s20 + $0x10] sm:$0xff] %vm1106_vm1, %v1052_v14  ;;  %v1055_v18 = vadd.f32 %v1393_v17, %v1224_v12  ;;  %v1046_v19 = vpop.f32.mrb[35].mxu0 }
 0x38c   : > { %1107 = vst.msk [vmem:[%s1666_s20] sm:$0xff] %vm1106_vm1, %v1044_v16  ;;  %v1047_v20 = vadd.f32 %v1224_v12, %v1046_v19 }
 0x38d   : > { %1110 = vst.msk [vmem:[%s1666_s20 + $0x18] sm:$0xff] %vm1106_vm1, %v1055_v18 }
 0x38e   : > { %1108 = vst.msk [vmem:[%s1666_s20 + $0x8] sm:$0xff] %vm1106_vm1, %v1047_v20 }
 0x390   : > { %v1396_v21 = vpop.f32.mrb[16].mxu1 }
 0x391   : > { %v1068_v22 = vadd.f32 %v1396_v21, %v1224_v12  ;;  %v1059_v23 = vpop.f32.mrb[17].mxu1 }
 0x392   : > { %v1060_v24 = vadd.f32 %v1224_v12, %v1059_v23  ;;  %v1397_v25 = vpop.f32.mrb[18].mxu1 }
 0x393   : > { %1113 = vst.msk [vmem:[%s1666_s20 + $0x30] sm:$0xff] %vm1106_vm1, %v1068_v22  ;;  %v1071_v26 = vadd.f32 %v1397_v25, %v1224_v12  ;;  %v1062_v27 = vpop.f32.mrb[19].mxu1 }
 0x394   : > { %1111 = vst.msk [vmem:[%s1666_s20 + $0x20] sm:$0xff] %vm1106_vm1, %v1060_v24  ;;  %v1063_v28 = vadd.f32 %v1224_v12, %v1062_v27 }
 0x395   : > { %1114 = vst.msk [vmem:[%s1666_s20 + $0x38] sm:$0xff] %vm1106_vm1, %v1071_v26 }
 0x396   : > { %1112 = vst.msk [vmem:[%s1666_s20 + $0x28] sm:$0xff] %vm1106_vm1, %v1063_v28 }
 0x398   : > { %v1400_v29 = vpop.f32.mrb[20].mxu1 }
 0x399   : > { %v1084_v30 = vadd.f32 %v1400_v29, %v1224_v12  ;;  %v1075_v31 = vpop.f32.mrb[21].mxu1 }
 0x39a   : > { %v1076_v32 = vadd.f32 %v1224_v12, %v1075_v31  ;;  %v1401_v33 = vpop.f32.mrb[22].mxu1 }
 0x39b   : > { %1117 = vst.msk [vmem:[%s1666_s20 + $0x50] sm:$0xff] %vm1106_vm1, %v1084_v30  ;;  %v1087_v34 = vadd.f32 %v1401_v33, %v1224_v12  ;;  %v1078_v35 = vpop.f32.mrb[23].mxu1 }
 0x39c   : > { %1115 = vst.msk [vmem:[%s1666_s20 + $0x40] sm:$0xff] %vm1106_vm1, %v1076_v32  ;;  %v1079_v36 = vadd.f32 %v1224_v12, %v1078_v35 }
 0x39d   : > { %1118 = vst.msk [vmem:[%s1666_s20 + $0x58] sm:$0xff] %vm1106_vm1, %v1087_v34 }
 0x39e   : > { %1116 = vst.msk [vmem:[%s1666_s20 + $0x48] sm:$0xff] %vm1106_vm1, %v1079_v36 }
 0x3a0   : > { %v1404_v37 = vpop.f32.mrb[24].mxu1 }
 0x3a1   : > { %v1100_v38 = vadd.f32 %v1404_v37, %v1224_v12  ;;  %v1091_v39 = vpop.f32.mrb[25].mxu1 }
 0x3a2   : > { %v1092_v40 = vadd.f32 %v1224_v12, %v1091_v39  ;;  %v1405_v41 = vpop.f32.mrb[26].mxu1 }
 0x3a3   : > { %1121 = vst.msk [vmem:[%s1666_s20 + $0x70] sm:$0xff] %vm1106_vm1, %v1100_v38  ;;  %v1103_v42 = vadd.f32 %v1405_v41, %v1224_v12  ;;  %v1094_v43 = vpop.f32.mrb[27].mxu1 }
 0x3a4   : > { %1119 = vst.msk [vmem:[%s1666_s20 + $0x60] sm:$0xff] %vm1106_vm1, %v1092_v40  ;;  %v1095_v44 = vadd.f32 %v1224_v12, %v1094_v43 }
 0x3a5   : > { %1122 = vst.msk [vmem:[%s1666_s20 + $0x78] sm:$0xff] %vm1106_vm1, %v1103_v42 }
 0x3a6   : > { %1120 = vst.msk [vmem:[%s1666_s20 + $0x68] sm:$0xff] %vm1106_vm1, %v1095_v44 }
 0x3a7 PF: > { %s19_s30 = sadd.s32 1, %s1501_s30  }
 0x3a8   : > { %p16_p4 = scmp.ge.s32.totalorder %s19_s30, 6  }
 0x3aa   :  { %18 = sbr.rel (!%p16_p4) target bundleno = 1 (0x1), region = 86 }

</bundles_post_ra>
